<compile_context>
chip_gen: v6e
topology: v6e:2x2x1
jax: 0.10.0
libtpu: 0.0.40
codegen_flags: <defaults>
</compile_context>

<pallas_src>
import functools
import math

import jax
import jax.numpy as jnp
import numpy as np
from jax.experimental import pallas as pl
from jax.experimental.pallas import tpu as pltpu


def _round_up(x, m):
    return ((x + m - 1) // m) * m


def _nbytes(shape, dtype):
    return math.prod(shape) * np.dtype(dtype).itemsize


# ---------------------------------------------------------------------------
# Pallas kernel: direct 3x3 conv (9 shifted MXU dots, f32 accumulate)
#                + folded-BN bias
#                + fused shortcut (f32 identity add OR 1x1 projection dot)
#                + optional ReLU.        One image per grid step.
# ---------------------------------------------------------------------------
def _conv3x3_bn_kernel(*refs, tap_starts, Ho, Wo, apply_relu, shortcut_mode,
                       pad_out):
    x_ref, w_ref, b_ref = refs[0], refs[1], refs[2]
    idx = 3
    res_ref = sx_ref = sw_ref = None
    if shortcut_mode == "identity":
        res_ref = refs[idx]; idx += 1
    elif shortcut_mode == "conv":
        sx_ref, sw_ref = refs[idx], refs[idx + 1]; idx += 2
    o_ref = refs[idx]

    K = x_ref.shape[-1]
    Cp = w_ref.shape[-1]
    M = Ho * Wo

    # 3x3 conv as 9 shifted (M, K) @ (K, Cp) dots; every tap reads a static,
    # contiguous window of the VMEM-resident slab (no HBM im2col).
    acc = jnp.zeros((M, Cp), jnp.float32)
    for t, (r0, c0) in enumerate(tap_starts):
        lhs = x_ref[0, r0:r0 + Ho, c0:c0 + Wo, :].reshape(M, K)
        acc = acc + jnp.dot(lhs, w_ref[t], preferred_element_type=jnp.float32)

    acc = acc + b_ref[...]                      # folded BN bias(es)

    if shortcut_mode == "conv":
        # 1x1 projection shortcut: one more accumulating MXU dot on the tile.
        sx = sx_ref[0].reshape(M, sx_ref.shape[-1])
        acc = acc + jnp.dot(sx, sw_ref[...], preferred_element_type=jnp.float32)

    y = acc.reshape(Ho, Wo, Cp)
    if shortcut_mode == "identity":
        y = y + res_ref[0]                      # f32 residual (tight numerics)

    if apply_relu:
        y = jnp.maximum(y, 0.0)
    y = y.astype(o_ref.dtype)

    if pad_out:
        # Emit the output already spatially zero-padded so the next 3x3 conv
        # consumes it directly (no HBM re-pad pass between the two convs).
        o_ref[0] = jnp.zeros(o_ref.shape[1:], o_ref.dtype)
        o_ref[0, 1:1 + Ho, 1:1 + Wo, :] = y
    else:
        o_ref[0] = y


# ---------------------------------------------------------------------------
# pallas_call wrapper
# ---------------------------------------------------------------------------
def conv3x3_bn_act(xp, w_taps, bias, *, tap_starts, Ho, Wo, shortcut=None,
                   apply_relu=True, pad_out=False, out_dtype=jnp.float32):
    """xp:      (N, Hp, Wp, K) bf16, spatially padded (+phase-reordered if the
                conv is strided).
       w_taps:  (9, K, Cp) bf16, BN scale folded, Cp % 128 == 0.
       bias:    (1, Cp) f32.
       shortcut: None | ("identity", res (N,Ho,Wo,Cp) f32)
                      | ("conv", sx (N,Ho,Wo,Cs) bf16, sw (Cs,Cp) bf16)
       Returns (N, Ho[+2], Wo[+2], Cp) of out_dtype (spatially padded output
       when pad_out=True)."""
    N, Hp, Wp, K = xp.shape
    n_taps, Kw, Cp = w_taps.shape
    assert n_taps == 9 and Kw == K and Cp % 128 == 0, (w_taps.shape, xp.shape)

    mode = "none"
    extra_args, extra_specs = [], []
    if shortcut is not None:
        mode = shortcut[0]
        if mode == "identity":
            res = shortcut[1]
            extra_args = [res]
            extra_specs = [pl.BlockSpec((1, Ho, Wo, Cp), lambda n: (n, 0, 0, 0))]
        elif mode == "conv":
            sx, sw = shortcut[1], shortcut[2]
            extra_args = [sx, sw]
            extra_specs = [
                pl.BlockSpec((1, Ho, Wo, sx.shape[-1]), lambda n: (n, 0, 0, 0)),
                pl.BlockSpec(sw.shape, lambda n: (0, 0)),
            ]

    Hout = Ho + 2 if pad_out else Ho
    Wout = Wo + 2 if pad_out else Wo

    # Explicit VMEM budgeting (double-buffered pipeline blocks), capped at
    # 64 MiB so it is safe on v7x as well as v5e/v6e.
    blocks = [((1, Hp, Wp, K), xp.dtype),
              (tuple(w_taps.shape), w_taps.dtype),
              (tuple(bias.shape), bias.dtype),
              ((1, Hout, Wout, Cp), out_dtype)]
    if mode == "identity":
        blocks.append(((1, Ho, Wo, Cp), extra_args[0].dtype))
    elif mode == "conv":
        blocks.append(((1, Ho, Wo, extra_args[0].shape[-1]), extra_args[0].dtype))
        blocks.append((tuple(extra_args[1].shape), extra_args[1].dtype))
    need = 2 * sum(_nbytes(s, d) for s, d in blocks)
    vmem_limit = int(min(max(need + (8 << 20), 32 << 20), 64 << 20))

    kernel = functools.partial(
        _conv3x3_bn_kernel, tap_starts=tuple(tap_starts), Ho=Ho, Wo=Wo,
        apply_relu=apply_relu, shortcut_mode=mode, pad_out=pad_out)

    return pl.pallas_call(
        kernel,
        out_shape=jax.ShapeDtypeStruct((N, Hout, Wout, Cp), out_dtype),
        grid=(N,),
        in_specs=[pl.BlockSpec((1, Hp, Wp, K), lambda n: (n, 0, 0, 0)),
                  pl.BlockSpec(w_taps.shape, lambda n: (0, 0, 0)),
                  pl.BlockSpec(bias.shape, lambda n: (0, 0))] + extra_specs,
        out_specs=pl.BlockSpec((1, Hout, Wout, Cp), lambda n: (n, 0, 0, 0)),
        compiler_params=pltpu.CompilerParams(
            dimension_semantics=("parallel",),       # >=2 images -> both v7x TCs
            vmem_limit_bytes=vmem_limit),
    )(xp, w_taps, bias, *extra_args)


# ---------------------------------------------------------------------------
# JAX glue: input prep (pad + stride phase-reorder), BN folding, weight prep
# ---------------------------------------------------------------------------
def _prep_conv_input(x_nhwc, stride):
    """Spatially pad by 1; for stride 2, reorder rows/cols into even/odd phase
    blocks so every 3x3 tap (and the strided 1x1 shortcut) is a contiguous
    static slice in-kernel.  Returns (xp, tap_starts, Ho, Wo)."""
    assert stride in (1, 2)
    N, H, W, C = x_nhwc.shape
    xp = jnp.pad(x_nhwc, ((0, 0), (1, 1), (1, 1), (0, 0)))
    Hp, Wp = H + 2, W + 2
    Ho = (Hp - 3) // stride + 1
    Wo = (Wp - 3) // stride + 1
    if stride == 1:
        starts_r = {k: k for k in range(3)}
        starts_c = {k: k for k in range(3)}
    else:
        xp = jnp.concatenate([xp[:, 0::2], xp[:, 1::2]], axis=1)
        xp = jnp.concatenate([xp[:, :, 0::2], xp[:, :, 1::2]], axis=2)
        ner, nec = (Hp + 1) // 2, (Wp + 1) // 2
        starts_r = {k: (k // 2 if k % 2 == 0 else ner + k // 2) for k in range(3)}
        starts_c = {k: (k // 2 if k % 2 == 0 else nec + k // 2) for k in range(3)}
    tap_starts = tuple((starts_r[kh], starts_c[kw])
                       for kh in range(3) for kw in range(3))
    return xp, tap_starts, Ho, Wo


def fold_bn(gamma, beta, mean, var, eps=1e-5):
    scale = gamma / jnp.sqrt(var + eps)
    bias = beta - mean * scale
    return scale, bias


def prep_conv3x3_weights(w_oihw, gamma, beta, mean, var, *, k_pad, c_pad):
    """(Cout, Cin, 3, 3) -> (9, k_pad, c_pad) bf16 (BN scale folded) and
    (1, c_pad) f32 bias, matching the in-kernel tap ordering."""
    co, ci, kh, kw = w_oihw.shape
    scale, bias = fold_bn(gamma, beta, mean, var)
    w = jnp.transpose(w_oihw, (2, 3, 1, 0)).reshape(kh * kw, ci, co) * scale
    w = jnp.pad(w, ((0, 0), (0, k_pad - ci), (0, c_pad - co)))
    b = jnp.pad(bias, (0, c_pad - co)).reshape(1, c_pad)
    return w.astype(jnp.bfloat16), b.astype(jnp.float32)


def prep_proj_weights(w_oi11, gamma, beta, mean, var, *, c_pad):
    """1x1 projection shortcut: (Cout, Cin, 1, 1) -> (Cin, c_pad) bf16 with BN
    scale folded, plus its (1, c_pad) f32 BN bias (to be folded into b2)."""
    co, ci = w_oi11.shape[0], w_oi11.shape[1]
    scale, bias = fold_bn(gamma, beta, mean, var)
    w = w_oi11.reshape(co, ci).T * scale
    w = jnp.pad(w, ((0, 0), (0, c_pad - co)))
    b = jnp.pad(bias, (0, c_pad - co)).reshape(1, c_pad)
    return w.astype(jnp.bfloat16), b.astype(jnp.float32)


# ---------------------------------------------------------------------------
# BasicBlock parameters + forward
# ---------------------------------------------------------------------------
def init_basic_block_params(key, in_planes, planes, stride):
    ks = jax.random.split(key, 16)
    p = {
        "conv1_w": 0.1 * jax.random.normal(ks[0], (planes, in_planes, 3, 3), jnp.float32),
        "bn1_gamma": 1.0 + 0.1 * jax.random.normal(ks[1], (planes,), jnp.float32),
        "bn1_beta": 0.1 * jax.random.normal(ks[2], (planes,), jnp.float32),
        "bn1_mean": 0.1 * jax.random.normal(ks[3], (planes,), jnp.float32),
        "bn1_var": jnp.abs(1.0 + 0.1 * jax.random.normal(ks[4], (planes,), jnp.float32)),
        "conv2_w": 0.1 * jax.random.normal(ks[5], (planes, planes, 3, 3), jnp.float32),
        "bn2_gamma": 1.0 + 0.1 * jax.random.normal(ks[6], (planes,), jnp.float32),
        "bn2_beta": 0.1 * jax.random.normal(ks[7], (planes,), jnp.float32),
        "bn2_mean": 0.1 * jax.random.normal(ks[8], (planes,), jnp.float32),
        "bn2_var": jnp.abs(1.0 + 0.1 * jax.random.normal(ks[9], (planes,), jnp.float32)),
    }
    p["has_shortcut"] = (stride != 1) or (in_planes != planes)
    if p["has_shortcut"]:
        p["sc_w"] = 0.1 * jax.random.normal(ks[10], (planes, in_planes, 1, 1), jnp.float32)
        p["sc_gamma"] = 1.0 + 0.1 * jax.random.normal(ks[11], (planes,), jnp.float32)
        p["sc_beta"] = 0.1 * jax.random.normal(ks[12], (planes,), jnp.float32)
        p["sc_mean"] = 0.1 * jax.random.normal(ks[13], (planes,), jnp.float32)
        p["sc_var"] = jnp.abs(1.0 + 0.1 * jax.random.normal(ks[14], (planes,), jnp.float32))
    return p


def basic_block_forward(x_nchw, params, stride):
    """BasicBlock.forward (inference BN).  NCHW f32 in/out like the nn.Module.
    # TODO(synk): in a full ResNet keep activations NHWC bf16 between blocks
    # and drop these boundary transposes / casts (one HBM pass each).
    """
    x_f32 = jnp.transpose(x_nchw, (0, 2, 3, 1)).astype(jnp.float32)   # NHWC
    N, H, W, Cin = x_f32.shape
    planes = params["conv1_w"].shape[0]
    Cp = _round_up(planes, 128)          # lane-dense channels, kept end-to-end
    x_bf = x_f32.astype(jnp.bfloat16)    # bf16 MXU operands

    # --- conv1 + bn1 + relu -> spatially padded bf16 NHWC, padded channels ---
    w1, b1 = prep_conv3x3_weights(
        params["conv1_w"], params["bn1_gamma"], params["bn1_beta"],
        params["bn1_mean"], params["bn1_var"], k_pad=Cin, c_pad=Cp)
    xp1, taps1, Ho, Wo = _prep_conv_input(x_bf, stride)
    out1p = conv3x3_bn_act(xp1, w1, b1, tap_starts=taps1, Ho=Ho, Wo=Wo,
                           apply_relu=True, pad_out=True,
                           out_dtype=jnp.bfloat16)     # (N, Ho+2, Wo+2, Cp)

    # --- shortcut operands (fused into the conv2 kernel, no extra launch) ---
    if params["has_shortcut"]:
        sw, sb = prep_proj_weights(
            params["sc_w"], params["sc_gamma"], params["sc_beta"],
            params["sc_mean"], params["sc_var"], c_pad=Cp)
        sx = x_bf[:, ::stride, ::stride, :]            # (N, Ho, Wo, Cin)
        shortcut = ("conv", sx, sw)
    else:
        sb = None
        res = jnp.pad(x_f32, ((0, 0), (0, 0), (0, 0), (0, Cp - Cin)))
        shortcut = ("identity", res)                   # f32 residual

    # --- conv2 + bn2 + shortcut add + relu (single fused kernel) ---
    w2, b2 = prep_conv3x3_weights(
        params["conv2_w"], params["bn2_gamma"], params["bn2_beta"],
        params["bn2_mean"], params["bn2_var"], k_pad=Cp, c_pad=Cp)
    if sb is not None:
        b2 = b2 + sb                                   # fold shortcut BN bias
    taps2 = tuple((kh, kw) for kh in range(3) for kw in range(3))
    out2 = conv3x3_bn_act(out1p, w2, b2, tap_starts=taps2, Ho=Ho, Wo=Wo,
                          shortcut=shortcut, apply_relu=True, pad_out=False,
                          out_dtype=jnp.float32)       # (N, Ho, Wo, Cp)

    out = out2[:, :, :, :planes]                       # single channel slice
    return jnp.transpose(out, (0, 3, 1, 2))            # -> NCHW


# ---------------------------------------------------------------------------
# Pure-JAX f32 reference for correctness check
# ---------------------------------------------------------------------------
def _ref_conv(x_nhwc, w_oihw, stride, padding):
    w_hwio = jnp.transpose(w_oihw, (2, 3, 1, 0))
    return jax.lax.conv_general_dilated(
        x_nhwc, w_hwio, (stride, stride), [(padding, padding)] * 2,
        dimension_numbers=("NHWC", "HWIO", "NHWC"))


def _ref_bn(x, g, b, m, v, eps=1e-5):
    return (x - m) / jnp.sqrt(v + eps) * g + b


def reference_forward(x_nchw, p, stride):
    x = jnp.transpose(x_nchw, (0, 2, 3, 1)).astype(jnp.float32)
    out = jax.nn.relu(_ref_bn(_ref_conv(x, p["conv1_w"], stride, 1),
                              p["bn1_gamma"], p["bn1_beta"], p["bn1_mean"], p["bn1_var"]))
    out = _ref_bn(_ref_conv(out, p["conv2_w"], 1, 1),
                  p["bn2_gamma"], p["bn2_beta"], p["bn2_mean"], p["bn2_var"])
    if p["has_shortcut"]:
        sc = _ref_bn(_ref_conv(x, p["sc_w"], stride, 0),
                     p["sc_gamma"], p["sc_beta"], p["sc_mean"], p["sc_var"])
    else:
        sc = x
    out = jax.nn.relu(out + sc)
    return jnp.transpose(out, (0, 3, 1, 2))


# ---------------------------------------------------------------------------
if __name__ == "__main__":
    key = jax.random.PRNGKey(0)
    k_x1, k_p1, k_x2, k_p2 = jax.random.split(key, 4)

    # Config 1: downsampling block with 1x1 projection shortcut (fused in-kernel).
    N, in_planes, planes, H, W, stride = 2, 4, 8, 16, 16, 2
    x1 = jax.random.normal(k_x1, (N, in_planes, H, W), jnp.float32)
    p1 = init_basic_block_params(k_p1, in_planes, planes, stride)
    out1 = jax.block_until_ready(basic_block_forward(x1, p1, stride))
    ref1 = jax.block_until_ready(reference_forward(x1, p1, stride))
    assert out1.shape == (N, planes, H // stride, W // stride), out1.shape
    # bf16 MXU operands -> relaxed tolerance vs. the f32 reference.
    assert jnp.allclose(out1, ref1, rtol=5e-2, atol=5e-2), \
        float(jnp.max(jnp.abs(out1 - ref1)))

    # Config 2: identity-shortcut block (stride 1, in_planes == planes).
    N2, planes2, H2, W2 = 2, 8, 8, 8
    x2 = jax.random.normal(k_x2, (N2, planes2, H2, W2), jnp.float32)
    p2 = init_basic_block_params(k_p2, planes2, planes2, 1)
    out2 = jax.block_until_ready(basic_block_forward(x2, p2, 1))
    ref2 = jax.block_until_ready(reference_forward(x2, p2, 1))
    assert out2.shape == (N2, planes2, H2, W2), out2.shape
    assert jnp.allclose(out2, ref2, rtol=5e-2, atol=5e-2), \
        float(jnp.max(jnp.abs(out2 - ref2)))

    print("KERNEL_OK")
</pallas_src>

<mosaic_0001>
module attributes {stable_mosaic.version = 11 : i64} {
  func.func @_conv3x3_bn_kernel(%arg0: i32, %arg1: memref<1x18x18x4xbf16, #tpu.memory_space<vmem>>, %arg2: memref<9x4x128xbf16, #tpu.memory_space<vmem>>, %arg3: memref<1x128xf32, #tpu.memory_space<vmem>>, %arg4: memref<1x10x10x128xbf16, #tpu.memory_space<vmem>>) attributes {dimension_semantics = [#tpu.dimension_semantics<parallel>], iteration_bounds = array<i64: 2>, scalar_prefetch = 0 : i64, scratch_operands = 0 : i64, tpu.core_type = #tpu.core_type<tc>, window_params = [{transform_indices = @transform_0, window_bounds = array<i64: 1, 18, 18, 4>}, {pipeline_mode = #tpu.pipeline_mode<synchronous>, transform_indices = @transform_1, window_bounds = array<i64: 9, 4, 128>}, {pipeline_mode = #tpu.pipeline_mode<synchronous>, transform_indices = @transform_2, window_bounds = array<i64: 1, 128>}, {transform_indices = @transform_3, window_bounds = array<i64: 1, 10, 10, 128>}]} {
    %cst = arith.constant 0.000000e+00 : f32
    %0 = vector.broadcast %cst : f32 to vector<64x128xf32>
    %c0 = arith.constant 0 : index
    %c0_0 = arith.constant 0 : index
    %c0_1 = arith.constant 0 : index
    %c0_2 = arith.constant 0 : index
    %1 = vector.load %arg1[%c0, %c0_0, %c0_1, %c0_2] : memref<1x18x18x4xbf16, #tpu.memory_space<vmem>>, vector<1x8x8x4xbf16>
    %2 = vector.shape_cast %1 : vector<1x8x8x4xbf16> to vector<8x8x4xbf16>
    %3 = vector.shape_cast %2 : vector<8x8x4xbf16> to vector<64x4xbf16>
    %c0_3 = arith.constant 0 : index
    %c0_4 = arith.constant 0 : index
    %c0_5 = arith.constant 0 : index
    %4 = vector.load %arg2[%c0_3, %c0_4, %c0_5] : memref<9x4x128xbf16, #tpu.memory_space<vmem>>, vector<1x4x128xbf16>
    %5 = vector.shape_cast %4 : vector<1x4x128xbf16> to vector<4x128xbf16>
    %cst_6 = arith.constant dense<0.000000e+00> : vector<64x128xf32>
    %6 = tpu.matmul %3, %5, %cst_6 {dimension_numbers = #tpu.dot_dimension_numbers<[1], [0], [0], [1], [0, 0, 1, 1], [], []>} : vector<64x4xbf16>, vector<4x128xbf16>, vector<64x128xf32> -> vector<64x128xf32>
    %7 = arith.addf %0, %6 : vector<64x128xf32>
    %c0_7 = arith.constant 0 : index
    %c0_8 = arith.constant 0 : index
    %c9 = arith.constant 9 : index
    %c0_9 = arith.constant 0 : index
    %8 = vector.load %arg1[%c0_7, %c0_8, %c9, %c0_9] : memref<1x18x18x4xbf16, #tpu.memory_space<vmem>>, vector<1x8x8x4xbf16>
    %9 = vector.shape_cast %8 : vector<1x8x8x4xbf16> to vector<8x8x4xbf16>
    %10 = vector.shape_cast %9 : vector<8x8x4xbf16> to vector<64x4xbf16>
    %c1 = arith.constant 1 : index
    %c0_10 = arith.constant 0 : index
    %c0_11 = arith.constant 0 : index
    %11 = vector.load %arg2[%c1, %c0_10, %c0_11] : memref<9x4x128xbf16, #tpu.memory_space<vmem>>, vector<1x4x128xbf16>
    %12 = vector.shape_cast %11 : vector<1x4x128xbf16> to vector<4x128xbf16>
    %cst_12 = arith.constant dense<0.000000e+00> : vector<64x128xf32>
    %13 = tpu.matmul %10, %12, %cst_12 {dimension_numbers = #tpu.dot_dimension_numbers<[1], [0], [0], [1], [0, 0, 1, 1], [], []>} : vector<64x4xbf16>, vector<4x128xbf16>, vector<64x128xf32> -> vector<64x128xf32>
    %14 = arith.addf %7, %13 : vector<64x128xf32>
    %c0_13 = arith.constant 0 : index
    %c0_14 = arith.constant 0 : index
    %c1_15 = arith.constant 1 : index
    %c0_16 = arith.constant 0 : index
    %15 = vector.load %arg1[%c0_13, %c0_14, %c1_15, %c0_16] : memref<1x18x18x4xbf16, #tpu.memory_space<vmem>>, vector<1x8x8x4xbf16>
    %16 = vector.shape_cast %15 : vector<1x8x8x4xbf16> to vector<8x8x4xbf16>
    %17 = vector.shape_cast %16 : vector<8x8x4xbf16> to vector<64x4xbf16>
    %c2 = arith.constant 2 : index
    %c0_17 = arith.constant 0 : index
    %c0_18 = arith.constant 0 : index
    %18 = vector.load %arg2[%c2, %c0_17, %c0_18] : memref<9x4x128xbf16, #tpu.memory_space<vmem>>, vector<1x4x128xbf16>
    %19 = vector.shape_cast %18 : vector<1x4x128xbf16> to vector<4x128xbf16>
    %cst_19 = arith.constant dense<0.000000e+00> : vector<64x128xf32>
    %20 = tpu.matmul %17, %19, %cst_19 {dimension_numbers = #tpu.dot_dimension_numbers<[1], [0], [0], [1], [0, 0, 1, 1], [], []>} : vector<64x4xbf16>, vector<4x128xbf16>, vector<64x128xf32> -> vector<64x128xf32>
    %21 = arith.addf %14, %20 : vector<64x128xf32>
    %c0_20 = arith.constant 0 : index
    %c9_21 = arith.constant 9 : index
    %c0_22 = arith.constant 0 : index
    %c0_23 = arith.constant 0 : index
    %22 = vector.load %arg1[%c0_20, %c9_21, %c0_22, %c0_23] : memref<1x18x18x4xbf16, #tpu.memory_space<vmem>>, vector<1x8x8x4xbf16>
    %23 = vector.shape_cast %22 : vector<1x8x8x4xbf16> to vector<8x8x4xbf16>
    %24 = vector.shape_cast %23 : vector<8x8x4xbf16> to vector<64x4xbf16>
    %c3 = arith.constant 3 : index
    %c0_24 = arith.constant 0 : index
    %c0_25 = arith.constant 0 : index
    %25 = vector.load %arg2[%c3, %c0_24, %c0_25] : memref<9x4x128xbf16, #tpu.memory_space<vmem>>, vector<1x4x128xbf16>
    %26 = vector.shape_cast %25 : vector<1x4x128xbf16> to vector<4x128xbf16>
    %cst_26 = arith.constant dense<0.000000e+00> : vector<64x128xf32>
    %27 = tpu.matmul %24, %26, %cst_26 {dimension_numbers = #tpu.dot_dimension_numbers<[1], [0], [0], [1], [0, 0, 1, 1], [], []>} : vector<64x4xbf16>, vector<4x128xbf16>, vector<64x128xf32> -> vector<64x128xf32>
    %28 = arith.addf %21, %27 : vector<64x128xf32>
    %c0_27 = arith.constant 0 : index
    %c9_28 = arith.constant 9 : index
    %c9_29 = arith.constant 9 : index
    %c0_30 = arith.constant 0 : index
    %29 = vector.load %arg1[%c0_27, %c9_28, %c9_29, %c0_30] : memref<1x18x18x4xbf16, #tpu.memory_space<vmem>>, vector<1x8x8x4xbf16>
    %30 = vector.shape_cast %29 : vector<1x8x8x4xbf16> to vector<8x8x4xbf16>
    %31 = vector.shape_cast %30 : vector<8x8x4xbf16> to vector<64x4xbf16>
    %c4 = arith.constant 4 : index
    %c0_31 = arith.constant 0 : index
    %c0_32 = arith.constant 0 : index
    %32 = vector.load %arg2[%c4, %c0_31, %c0_32] : memref<9x4x128xbf16, #tpu.memory_space<vmem>>, vector<1x4x128xbf16>
    %33 = vector.shape_cast %32 : vector<1x4x128xbf16> to vector<4x128xbf16>
    %cst_33 = arith.constant dense<0.000000e+00> : vector<64x128xf32>
    %34 = tpu.matmul %31, %33, %cst_33 {dimension_numbers = #tpu.dot_dimension_numbers<[1], [0], [0], [1], [0, 0, 1, 1], [], []>} : vector<64x4xbf16>, vector<4x128xbf16>, vector<64x128xf32> -> vector<64x128xf32>
    %35 = arith.addf %28, %34 : vector<64x128xf32>
    %c0_34 = arith.constant 0 : index
    %c9_35 = arith.constant 9 : index
    %c1_36 = arith.constant 1 : index
    %c0_37 = arith.constant 0 : index
    %36 = vector.load %arg1[%c0_34, %c9_35, %c1_36, %c0_37] : memref<1x18x18x4xbf16, #tpu.memory_space<vmem>>, vector<1x8x8x4xbf16>
    %37 = vector.shape_cast %36 : vector<1x8x8x4xbf16> to vector<8x8x4xbf16>
    %38 = vector.shape_cast %37 : vector<8x8x4xbf16> to vector<64x4xbf16>
    %c5 = arith.constant 5 : index
    %c0_38 = arith.constant 0 : index
    %c0_39 = arith.constant 0 : index
    %39 = vector.load %arg2[%c5, %c0_38, %c0_39] : memref<9x4x128xbf16, #tpu.memory_space<vmem>>, vector<1x4x128xbf16>
    %40 = vector.shape_cast %39 : vector<1x4x128xbf16> to vector<4x128xbf16>
    %cst_40 = arith.constant dense<0.000000e+00> : vector<64x128xf32>
    %41 = tpu.matmul %38, %40, %cst_40 {dimension_numbers = #tpu.dot_dimension_numbers<[1], [0], [0], [1], [0, 0, 1, 1], [], []>} : vector<64x4xbf16>, vector<4x128xbf16>, vector<64x128xf32> -> vector<64x128xf32>
    %42 = arith.addf %35, %41 : vector<64x128xf32>
    %c0_41 = arith.constant 0 : index
    %c1_42 = arith.constant 1 : index
    %c0_43 = arith.constant 0 : index
    %c0_44 = arith.constant 0 : index
    %43 = vector.load %arg1[%c0_41, %c1_42, %c0_43, %c0_44] : memref<1x18x18x4xbf16, #tpu.memory_space<vmem>>, vector<1x8x8x4xbf16>
    %44 = vector.shape_cast %43 : vector<1x8x8x4xbf16> to vector<8x8x4xbf16>
    %45 = vector.shape_cast %44 : vector<8x8x4xbf16> to vector<64x4xbf16>
    %c6 = arith.constant 6 : index
    %c0_45 = arith.constant 0 : index
    %c0_46 = arith.constant 0 : index
    %46 = vector.load %arg2[%c6, %c0_45, %c0_46] : memref<9x4x128xbf16, #tpu.memory_space<vmem>>, vector<1x4x128xbf16>
    %47 = vector.shape_cast %46 : vector<1x4x128xbf16> to vector<4x128xbf16>
    %cst_47 = arith.constant dense<0.000000e+00> : vector<64x128xf32>
    %48 = tpu.matmul %45, %47, %cst_47 {dimension_numbers = #tpu.dot_dimension_numbers<[1], [0], [0], [1], [0, 0, 1, 1], [], []>} : vector<64x4xbf16>, vector<4x128xbf16>, vector<64x128xf32> -> vector<64x128xf32>
    %49 = arith.addf %42, %48 : vector<64x128xf32>
    %c0_48 = arith.constant 0 : index
    %c1_49 = arith.constant 1 : index
    %c9_50 = arith.constant 9 : index
    %c0_51 = arith.constant 0 : index
    %50 = vector.load %arg1[%c0_48, %c1_49, %c9_50, %c0_51] : memref<1x18x18x4xbf16, #tpu.memory_space<vmem>>, vector<1x8x8x4xbf16>
    %51 = vector.shape_cast %50 : vector<1x8x8x4xbf16> to vector<8x8x4xbf16>
    %52 = vector.shape_cast %51 : vector<8x8x4xbf16> to vector<64x4xbf16>
    %c7 = arith.constant 7 : index
    %c0_52 = arith.constant 0 : index
    %c0_53 = arith.constant 0 : index
    %53 = vector.load %arg2[%c7, %c0_52, %c0_53] : memref<9x4x128xbf16, #tpu.memory_space<vmem>>, vector<1x4x128xbf16>
    %54 = vector.shape_cast %53 : vector<1x4x128xbf16> to vector<4x128xbf16>
    %cst_54 = arith.constant dense<0.000000e+00> : vector<64x128xf32>
    %55 = tpu.matmul %52, %54, %cst_54 {dimension_numbers = #tpu.dot_dimension_numbers<[1], [0], [0], [1], [0, 0, 1, 1], [], []>} : vector<64x4xbf16>, vector<4x128xbf16>, vector<64x128xf32> -> vector<64x128xf32>
    %56 = arith.addf %49, %55 : vector<64x128xf32>
    %c0_55 = arith.constant 0 : index
    %c1_56 = arith.constant 1 : index
    %c1_57 = arith.constant 1 : index
    %c0_58 = arith.constant 0 : index
    %57 = vector.load %arg1[%c0_55, %c1_56, %c1_57, %c0_58] : memref<1x18x18x4xbf16, #tpu.memory_space<vmem>>, vector<1x8x8x4xbf16>
    %58 = vector.shape_cast %57 : vector<1x8x8x4xbf16> to vector<8x8x4xbf16>
    %59 = vector.shape_cast %58 : vector<8x8x4xbf16> to vector<64x4xbf16>
    %c8 = arith.constant 8 : index
    %c0_59 = arith.constant 0 : index
    %c0_60 = arith.constant 0 : index
    %60 = vector.load %arg2[%c8, %c0_59, %c0_60] : memref<9x4x128xbf16, #tpu.memory_space<vmem>>, vector<1x4x128xbf16>
    %61 = vector.shape_cast %60 : vector<1x4x128xbf16> to vector<4x128xbf16>
    %cst_61 = arith.constant dense<0.000000e+00> : vector<64x128xf32>
    %62 = tpu.matmul %59, %61, %cst_61 {dimension_numbers = #tpu.dot_dimension_numbers<[1], [0], [0], [1], [0, 0, 1, 1], [], []>} : vector<64x4xbf16>, vector<4x128xbf16>, vector<64x128xf32> -> vector<64x128xf32>
    %63 = arith.addf %56, %62 : vector<64x128xf32>
    %c0_62 = arith.constant 0 : index
    %c0_63 = arith.constant 0 : index
    %64 = vector.load %arg3[%c0_62, %c0_63] : memref<1x128xf32, #tpu.memory_space<vmem>>, vector<1x128xf32>
    %65 = vector.broadcast %64 : vector<1x128xf32> to vector<64x128xf32>
    %66 = arith.addf %63, %65 : vector<64x128xf32>
    %67 = vector.shape_cast %66 : vector<64x128xf32> to vector<8x8x128xf32>
    %cst_64 = arith.constant 0.000000e+00 : f32
    %68 = vector.broadcast %cst_64 : f32 to vector<8x8x128xf32>
    %69 = arith.maximumf %67, %68 : vector<8x8x128xf32>
    %70 = arith.truncf %69 : vector<8x8x128xf32> to vector<8x8x128xbf16>
    %cst_65 = arith.constant 0.000000e+00 : bf16
    %71 = vector.broadcast %cst_65 : bf16 to vector<10x10x128xbf16>
    %c0_66 = arith.constant 0 : index
    %c0_67 = arith.constant 0 : index
    %c0_68 = arith.constant 0 : index
    %c0_69 = arith.constant 0 : index
    %72 = vector.load %arg4[%c0_66, %c0_67, %c0_68, %c0_69] : memref<1x10x10x128xbf16, #tpu.memory_space<vmem>>, vector<1x10x10x128xbf16>
    %73 = vector.shape_cast %72 : vector<1x10x10x128xbf16> to vector<10x10x128xbf16>
    %74 = vector.shape_cast %71 : vector<10x10x128xbf16> to vector<1x10x10x128xbf16>
    tpu.vector_store %arg4[%c0_66, %c0_67, %c0_68, %c0_69], %74 {strides = array<i32>} : memref<1x10x10x128xbf16, #tpu.memory_space<vmem>>, vector<1x10x10x128xbf16>,
    %c0_70 = arith.constant 0 : index
    %c1_71 = arith.constant 1 : index
    %c1_72 = arith.constant 1 : index
    %c0_73 = arith.constant 0 : index
    %75 = vector.load %arg4[%c0_70, %c1_71, %c1_72, %c0_73] : memref<1x10x10x128xbf16, #tpu.memory_space<vmem>>, vector<1x8x8x128xbf16>
    %76 = vector.shape_cast %75 : vector<1x8x8x128xbf16> to vector<8x8x128xbf16>
    %77 = vector.shape_cast %70 : vector<8x8x128xbf16> to vector<1x8x8x128xbf16>
    tpu.vector_store %arg4[%c0_70, %c1_71, %c1_72, %c0_73], %77 {strides = array<i32>} : memref<1x10x10x128xbf16, #tpu.memory_space<vmem>>, vector<1x8x8x128xbf16>,
    return
  }
  func.func @transform_0(%arg0: i32) -> (i32, i32, i32, i32) {
    %c0_i32 = arith.constant 0 : i32
    %c0_i32_0 = arith.constant 0 : i32
    %c0_i32_1 = arith.constant 0 : i32
    %c0_i32_2 = arith.constant 0 : i32
    return %arg0, %c0_i32, %c0_i32_0, %c0_i32_1 : i32, i32, i32, i32
  }
  func.func @transform_1(%arg0: i32) -> (i32, i32, i32) {
    %c0_i32 = arith.constant 0 : i32
    %c0_i32_0 = arith.constant 0 : i32
    %c0_i32_1 = arith.constant 0 : i32
    %c0_i32_2 = arith.constant 0 : i32
    return %c0_i32, %c0_i32_0, %c0_i32_1 : i32, i32, i32
  }
  func.func @transform_2(%arg0: i32) -> (i32, i32) {
    %c0_i32 = arith.constant 0 : i32
    %c0_i32_0 = arith.constant 0 : i32
    %c0_i32_1 = arith.constant 0 : i32
    return %c0_i32, %c0_i32_0 : i32, i32
  }
  func.func @transform_3(%arg0: i32) -> (i32, i32, i32, i32) {
    %c0_i32 = arith.constant 0 : i32
    %c0_i32_0 = arith.constant 0 : i32
    %c0_i32_1 = arith.constant 0 : i32
    %c0_i32_2 = arith.constant 0 : i32
    return %arg0, %c0_i32, %c0_i32_0, %c0_i32_1 : i32, i32, i32, i32
  }
}

</mosaic_0001>

<bundles_post_ra>
// kernel: tpu_custom_call.1
= control target key start
LH: loop header
LB: loop body
LE: loop exit
PB: predicated region body
PF: predicated region fallthrough
CT: control target
= control target key end

     0   :  { %s2578_s12 = smov 0   ;;  %s3123_s0 = inlined_call_operand.vmem [shape: bf16[2,18,18,4], index: 0, kind: input, shape index: {}]   ;;  %s3124_s1 = inlined_call_operand.vmem [shape: bf16[9,4,128], index: 1, kind: input, shape index: {}]   ;;  %s3125_s2 = inlined_call_operand.vmem [shape: f32[1,128], index: 2, kind: input, shape index: {}]   ;;  %s3126_s3 = inlined_call_operand.vmem [shape: bf16[2,10,10,128], index: 3, kind: output, shape index: {}]  }
   0x1 LB: > { %s2161_s13 = sadd.s32 4294967295, %s2555_s12   ;;  %p2165_p0 = scmp.ge.s32.totalorder %s2555_s12, 1  ;;  %s2555_s12 = sphi %s2578_s12, %s13_s12  }
   0x2   : > { %p137_p1 = scmp.lt.s32.totalorder %s2555_s12, 3 }
   0x4   : > { %p138_p2 = pnand %p2165_p0, %p137_p1 }
   0x5   : > { %p161_p3 = scmp.lt.s32.totalorder (!%p138_p2), %s2161_s13, 1 }
   0x6   : > { %141 = sbr.rel (%p138_p2) target bundleno = 355 (0x163), region = 32 }
   0xb   : > { %v2168_v0 = vld [vmem:[%s3124_s1 + $0x2] sm:$0x3]  ;;  %vm339_vm0 = vcmask 1041408   ;;  %v180_v2 = vld [vmem:[%s3124_s1] sm:$0x3]  ;;  %s3134_s13 = smov (!%p161_p3, %s2161_s13), 1 }
   0xc   : > { %2517 = vmatprep.subr.msk.bf16.mxu1 %vm339_vm0, %v2168_v0  ;;  %2516 = vmatprep.subr.msk.bf16.mxu0 %vm339_vm0, %v2168_v0  ;;  %v341_v1 = vsel %vm339_vm0, %v2168_v0, 0  ;;  %v2185_v3 = vld [vmem:[%s3124_s1 + $0x4] sm:$0x3]  ;;  %v2605_v4 = vld [vmem:[%s3124_s1 + $0x6] sm:$0x3]  ;;  %s2526_s24 = smul.u32 216, %s3134_s13 }
   0xd   : > { %2515 = vmatpush3.bf16.msra.mxu1 %v341_v1  ;;  %2425 = vmatpush3.bf16.msra.mxu0 %v341_v1  ;;  %v2610_v5 = vld [vmem:[%s3124_s1 + $0x8] sm:$0x3]  ;;  %vm197_vm1 = vsmask.f32 3328  ;;  %vm198_vm2 = vsmask.f32 7440 }
   0xe   : > { %2518 = vmatprep.subr.msk.bf16.mxu1 %vm339_vm0, %v180_v2  ;;  %2519 = vmatprep.subr.msk.bf16.mxu0 %vm339_vm0, %v2185_v3  ;;  %s2616_s27 = scalar_lea.vmem %s3123_s0, %s2526_s24  ;;  %v2619_v6 = vsel %vm339_vm0, %v180_v2, 0  ;;  %v2622_v7 = vsel %vm339_vm0, %v2185_v3, 0  ;;  %v2626_v8 = vsel %vm339_vm0, %v2605_v4, 0  ;;  %v2630_v9 = vsel %vm339_vm0, %v2610_v5, 0  ;;  %vm2643_vm4 = vmor %vm197_vm1, %vm198_vm2  ;;  %s2527_s9 = smul.u32 80, %s3134_s13 }
   0xf   : > { %v181_v10 = vld [vmem:[%s2616_s27 + $0x4] sm:$0xf]  ;;  %v182_v11 = vld [vmem:[%s2616_s27 + $0x8] sm:$0x1]  ;;  %v183_v12 = vld [vmem:[%s2616_s27 + $0x10] sm:$0xf] }
  0x10   : > { %v184_v13 = vld [vmem:[%s2616_s27 + $0x14] sm:$0x1]  ;;  %v201_v14 = vshrl.u32 %v181_v10, 16  ;;  %v204_v15 = vshll.u32 %v181_v10, 16  ;;  %v210_v16 = vshll.u32 %v182_v11, 16  ;;  %v215_v17 = vshrl.u32 %v183_v12, 16  ;;  %s2927_s14 = scalar_lea.vmem %s3126_s3, %s2527_s9 }
  0x11   : > { %v218_v18 = vshll.u32 %v183_v12, 16  ;;  %v224_v19 = vshll.u32 %v184_v13, 16  ;;  %vm326_vm3 = vcmask 31744   ;;  %v189_v20 = vld [vmem:[%s2616_s27 + $0x34] sm:$0xf]  ;;  %v2557_v37 = vmov 0  }
  0x12   : > { %v190_v21 = vld [vmem:[%s2616_s27 + $0x38] sm:$0x1]  ;;  %v203_v22 = vrot.slane %v201_v14, 4  ;;  %v206_v23 = vrot.slane %v204_v15, 5  ;;  %v212_v24 = vrot.slane %v210_v16, 5  ;;  %v217_v25 = vrot.slane %v215_v17, 4 }
  0x13   : > { %v191_v26 = vld [vmem:[%s2616_s27 + $0x40] sm:$0xf]  ;;  %v220_v27 = vrot.slane %v218_v18, 5  ;;  %v226_v28 = vrot.slane %v224_v19, 5  ;;  %v192_v29 = vld [vmem:[%s2616_s27 + $0x44] sm:$0x1] }
  0x14   : > { %v257_v30 = vshrl.u32 %v189_v20, 16  ;;  %v260_v31 = vshll.u32 %v189_v20, 16  ;;  %v207_v32 = vor.u32 %v206_v23, %v203_v22  ;;  %v266_v33 = vshll.u32 %v190_v21, 16  ;;  %v185_v36 = vld [vmem:[%s2616_s27 + $0x1c] sm:$0xf]  ;;  %1927 = vst [vmem:[%s2927_s14] sm:$0xf] %v2557_v37 }
  0x15   : > { %v271_v34 = vshrl.u32 %v191_v26, 16  ;;  %v274_v35 = vshll.u32 %v191_v26, 16  ;;  %v221_v38 = vor.u32 %v220_v27, %v217_v25  ;;  %v280_v41 = vshll.u32 %v192_v29, 16  ;;  %v186_v42 = vld [vmem:[%s2616_s27 + $0x20] sm:$0x1] }
  0x16   : > { %v259_v39 = vrot.slane %v257_v30, 4  ;;  %v262_v40 = vrot.slane %v260_v31, 5  ;;  %v208_v43 = vrot.slane %v207_v32, 4  ;;  %v268_v44 = vrot.slane %v266_v33, 5  ;;  %v187_v47 = vld [vmem:[%s2616_s27 + $0x28] sm:$0xf] }
  0x17   : > { %v273_v45 = vrot.slane %v271_v34, 4  ;;  %v276_v46 = vrot.slane %v274_v35, 5  ;;  %v222_v48 = vrot.slane %v221_v38, 4  ;;  %v282_v50 = vrot.slane %v280_v41, 5  ;;  %v188_v54 = vld [vmem:[%s2616_s27 + $0x2c] sm:$0x1] }
  0x18   : > { %v263_v49 = vor.u32 %v262_v40, %v259_v39  ;;  %v229_v51 = vshrl.u32 %v185_v36, 16  ;;  %v213_v52 = vsel %vm2643_vm4, %v208_v43, %v212_v24  ;;  %v232_v55 = vshll.u32 %v185_v36, 16  ;;  %v193_v57 = vld [vmem:[%s2616_s27 + $0x4c] sm:$0xf]  ;;  %v194_v62 = vld [vmem:[%s2616_s27 + $0x50] sm:$0x1] }
  0x19   : > { %v277_v53 = vor.u32 %v276_v46, %v273_v45  ;;  %v238_v56 = vshll.u32 %v186_v42, 16  ;;  %v227_v58 = vsel %vm2643_vm4, %v222_v48, %v226_v28  ;;  %v243_v61 = vshrl.u32 %v187_v47, 16  ;;  %v195_v3 = vld [vmem:[%s2616_s27 + $0x58] sm:$0xf]  ;;  %v196_v16 = vld [vmem:[%s2616_s27 + $0x5c] sm:$0x1] }
  0x1a   : > { %v264_v59 = vrot.slane %v263_v49, 4  ;;  %v231_v60 = vrot.slane %v229_v51, 4  ;;  %v2169_v63 = vcombine.low %v213_v52, %v227_v58  ;;  %v234_v1 = vrot.slane %v232_v55, 5  ;;  %v508_v23 = vld [vmem:[%s2616_s27] sm:$0xf] }
  0x1b   : > { %v278_v0 = vrot.slane %v277_v53, 4  ;;  %v240_v2 = vrot.slane %v238_v56, 5  ;;  %v245_v11 = vrot.slane %v243_v61, 4  ;;  %v246_v12 = vshll.u32 %v187_v47, 16  ;;  %v509_v28 = vld [vmem:[%s2616_s27 + $0x4] sm:$0x1] }
  0x1c   : > { %v269_v10 = vsel %vm2643_vm4, %v264_v59, %v268_v44  ;;  %v252_v13 = vshll.u32 %v188_v54, 16  ;;  %2426 = vmatprep.mubr.msk.bf16.mxu0 %vm326_vm3, %v2169_v63  ;;  %v235_v15 = vor.u32 %v234_v1, %v231_v60  ;;  %v285_v17 = vshrl.u32 %v193_v57, 16  ;;  %v510_v33 = vld [vmem:[%s2616_s27 + $0xc] sm:$0xf]  ;;  %v511_v44 = vld [vmem:[%s2616_s27 + $0x10] sm:$0x1] }
  0x1d   : > { %v283_v14 = vsel %vm2643_vm4, %v278_v0, %v282_v50  ;;  %v288_v18 = vshll.u32 %v193_v57, 16  ;;  %v248_v20 = vrot.slane %v246_v12, 5  ;;  %v294_v22 = vshll.u32 %v194_v62, 16  ;;  %v512_v52 = vld [vmem:[%s2616_s27 + $0x18] sm:$0xf] }
  0x1e   : > { %v2171_v19 = vcombine.low %v269_v10, %v283_v14  ;;  %v254_v21 = vrot.slane %v252_v13, 5  ;;  %v236_v24 = vrot.slane %v235_v15, 4  ;;  %v287_v25 = vrot.slane %v285_v17, 4  ;;  %v513_v53 = vld [vmem:[%s2616_s27 + $0x1c] sm:$0x1] }
  0x1f   : > { %v290_v26 = vrot.slane %v288_v18, 5  ;;  %v299_v27 = vshrl.u32 %v195_v3, 16  ;;  %v249_v29 = vor.u32 %v248_v20, %v245_v11  ;;  %v296_v30 = vrot.slane %v294_v22, 5  ;;  %v514_v58 = vld [vmem:[%s2616_s27 + $0x24] sm:$0xf] }
  0x20   : > { %2430 = vmatprep.mubr.msk.bf16.mxu1 %vm326_vm3, %v2171_v19  ;;  %v302_v31 = vshll.u32 %v195_v3, 16  ;;  %v308_v32 = vshll.u32 %v196_v16, 16  ;;  %v241_v34 = vsel %vm2643_vm4, %v236_v24, %v240_v2  ;;  %v525_v38 = vshrl.u32 %v508_v23, 16  ;;  %v2537_v60 = vld [vmem:[%s2616_s27] ss:$12 sps:$4 sm:$0xff]  }
  0x21   : > { %v291_v35 = vor.u32 %v290_v26, %v287_v25  ;;  %v301_v36 = vrot.slane %v299_v27, 4  ;;  %v250_v39 = vrot.slane %v249_v29, 4  ;;  %v528_v42 = vshll.u32 %v508_v23, 16  ;;  %v515_v14 = vld [vmem:[%s2616_s27 + $0x28] sm:$0x1] }
  0x22   : > { %v304_v40 = vrot.slane %v302_v31, 5  ;;  %v310_v41 = vrot.slane %v308_v32, 5  ;;  %v527_v45 = vrot.slane %v525_v38, 4  ;;  %v534_v46 = vshll.u32 %v509_v28, 16  ;;  %v516_v15 = vld [vmem:[%s2616_s27 + $0x30] sm:$0xf] }
  0x23   : > { %v292_v43 = vrot.slane %v291_v35, 4  ;;  %v539_v47 = vshrl.u32 %v510_v33, 16  ;;  %v255_v48 = vsel %vm2643_vm4, %v250_v39, %v254_v21  ;;  %v530_v50 = vrot.slane %v528_v42, 5  ;;  %v517_v20 = vld [vmem:[%s2616_s27 + $0x34] sm:$0x1] }
  0x24   : > { %v305_v49 = vor.u32 %v304_v40, %v301_v36  ;;  %v542_v51 = vshll.u32 %v510_v33, 16  ;;  %v2170_v54 = vcombine.low %v241_v34, %v255_v48  ;;  %v536_v56 = vrot.slane %v534_v46, 5  ;;  %v518_v24 = vld [vmem:[%s2616_s27 + $0x3c] sm:$0xf]  ;;  %v2538_v33 = vld [vmem:[%s2616_s27 + $0x18] ss:$12 sps:$4 sm:$0xff]  }
  0x25   : > { %v297_v55 = vsel %vm2643_vm4, %v292_v43, %v296_v30  ;;  %v541_v57 = vrot.slane %v539_v47, 4  ;;  %v531_v61 = vor.u32 %v530_v50, %v527_v45  ;;  %v548_v63 = vshll.u32 %v511_v44, 16  ;;  %v519_v30 = vld [vmem:[%s2616_s27 + $0x40] sm:$0x1]  ;;  %v2539_v39 = vld [vmem:[%s2616_s27 + $0x30] ss:$12 sps:$4 sm:$0xff]  }
  0x26   : > { %v306_v59 = vrot.slane %v305_v49, 4  ;;  %v544_v62 = vrot.slane %v542_v51, 5  ;;  %2427 = vmatmul.mubr.msk.bf16.vlgmr.msra.gmra.mxu0 %vm326_vm3, %v2170_v54  ;;  %v553_v0 = vshrl.u32 %v512_v52, 16  ;;  %v556_v1 = vshll.u32 %v512_v52, 16  ;;  %v520_v44 = vld [vmem:[%s2616_s27 + $0x48] sm:$0xf] }
  0x27   : > { %v562_v2 = vshll.u32 %v513_v53, 16  ;;  %v567_v3 = vshrl.u32 %v514_v58, 16  ;;  %2445 = vmatpush3.bf16.msra.mxu0 %v2622_v7  ;;  %v532_v11 = vrot.slane %v531_v61, 4  ;;  %v550_v13 = vrot.slane %v548_v63, 5  ;;  %v521_v45 = vld [vmem:[%s2616_s27 + $0x4c] sm:$0x1] }
  0x28   : > { %v311_v10 = vsel %vm2643_vm4, %v306_v59, %v310_v41  ;;  %v545_v12 = vor.u32 %v544_v62, %v541_v57  ;;  %v555_v17 = vrot.slane %v553_v0, 4  ;;  %v558_v18 = vrot.slane %v556_v1, 5  ;;  %2521 = vmatprep.subr.msk.bf16.mxu0 %vm339_vm0, %v2610_v5  ;;  %v522_v49 = vld [vmem:[%s2616_s27 + $0x54] sm:$0xf]  ;;  %v523_v50 = vld [vmem:[%s2616_s27 + $0x58] sm:$0x1] }
  0x29   : > { %v2172_v16 = vcombine.low %v297_v55, %v311_v10  ;;  %v564_v19 = vrot.slane %v562_v2, 5  ;;  %v537_v21 = vsel %vm2643_vm4, %v532_v11, %v536_v56  ;;  %v569_v7 = vrot.slane %v567_v3, 4  ;;  %v2211_v0 = vld [vmem:[%s2616_s27 + $0x70] sm:$0xf]  ;;  %v2269_v1 = vld [vmem:[%s3124_s1 + $0xc] sm:$0x3] }
  0x2a   : > { %v546_v22 = vrot.slane %v545_v12, 4  ;;  %v570_v23 = vshll.u32 %v514_v58, 16  ;;  %v559_v25 = vor.u32 %v558_v18, %v555_v17  ;;  %v576_v26 = vshll.u32 %v515_v14, 16  ;;  %v2212_v11 = vld [vmem:[%s2616_s27 + $0x74] sm:$0x1] }
  0x2b   : > { %2431 = vmatmul.mubr.msk.bf16.vlgmr.msra.gmra.mxu1 %vm326_vm3, %v2172_v16  ;;  %v581_v27 = vshrl.u32 %v516_v15, 16  ;;  %v584_v28 = vshll.u32 %v516_v15, 16  ;;  %v595_v31 = vshrl.u32 %v518_v24, 16  ;;  %v590_v36 = vshll.u32 %v517_v20, 16  ;;  %v2540_v15 = vld [vmem:[%s2616_s27 + $0x48] ss:$12 sps:$4 sm:$0xff]  }
  0x2c   : > { %2435 = vmatpush3.bf16.msra.mxu1 %v2619_v6  ;;  %2436 = vmatprep.mubr.msk.bf16.mxu1 %vm326_vm3, %v2537_v60  ;;  %v551_v5 = vsel %vm2643_vm4, %v546_v22, %v550_v13  ;;  %v572_v29 = vrot.slane %v570_v23, 5  ;;  %v560_v34 = vrot.slane %v559_v25, 4  ;;  %v578_v38 = vrot.slane %v576_v26, 5  ;;  %v2213_v17 = vld [vmem:[%s2616_s27 + $0x7c] sm:$0xf] }
  0x2d   : > { %v2186_v32 = vcombine.low %v537_v21, %v551_v5  ;;  %2520 = vmatprep.subr.msk.bf16.mxu1 %vm339_vm0, %v2605_v4  ;;  %v583_v35 = vrot.slane %v581_v27, 4  ;;  %v586_v40 = vrot.slane %v584_v28, 5  ;;  %v597_v41 = vrot.slane %v595_v31, 4  ;;  %v2252_v4 = vld [vmem:[%s3124_s1 + $0xa] sm:$0x3] }
  0x2e   : > { %v573_v6 = vor.u32 %v572_v29, %v569_v7  ;;  %v598_v42 = vshll.u32 %v518_v24, 16  ;;  %v604_v43 = vshll.u32 %v519_v30, 16  ;;  %v565_v46 = vsel %vm2643_vm4, %v560_v34, %v564_v19  ;;  %v2214_v18 = vld [vmem:[%s2616_s27 + $0x80] sm:$0x1]  ;;  %v2541_v5 = vld [vmem:[%s2616_s27 + $0x6c] ss:$12 sps:$4 sm:$0xff]  }
  0x2f   : > { %2446 = vmatprep.mubr.msk.bf16.mxu0 %vm326_vm3, %v2186_v32  ;;  %v587_v48 = vor.u32 %v586_v40, %v583_v35  ;;  %v609_v51 = vshrl.u32 %v520_v44, 16  ;;  %v592_v52 = vrot.slane %v590_v36, 5  ;;  %v612_v54 = vshll.u32 %v520_v44, 16  ;;  %v2215_v29 = vld [vmem:[%s2616_s27 + $0x88] sm:$0xf] }
  0x30   : > { %v574_v47 = vrot.slane %v573_v6, 4  ;;  %v600_v53 = vrot.slane %v598_v42, 5  ;;  %v618_v55 = vshll.u32 %v521_v45, 16  ;;  %v623_v59 = vshrl.u32 %v522_v49, 16  ;;  %v2743_v35 = vld [vmem:[%s3124_s1 + $0xe] sm:$0x3] }
  0x31   : > { %v588_v57 = vrot.slane %v587_v48, 4  ;;  %v611_v58 = vrot.slane %v609_v51, 4  ;;  %v606_v62 = vrot.slane %v604_v43, 5  ;;  %v614_v63 = vrot.slane %v612_v54, 5  ;;  %v2218_v40 = vld [vmem:[%s2616_s27 + $0x98] sm:$0x1] }
  0x32   : > { %v579_v56 = vsel %vm2643_vm4, %v574_v47, %v578_v38  ;;  %v601_v61 = vor.u32 %v600_v53, %v597_v41  ;;  %v625_v2 = vrot.slane %v623_v59, 4  ;;  %v626_v3 = vshll.u32 %v522_v49, 16  ;;  %v2219_v54 = vld [vmem:[%s2616_s27 + $0xa0] sm:$0xf]  ;;  %1933 = vst [vmem:[%s2927_s14 + $0x18] sm:$0xf] %v2557_v37 }
  0x33   : > { %2437 = vmatmul.mubr.msk.bf16.vlgmr.msra.gmra.mxu1 %vm326_vm3, %v2538_v33  ;;  %v2187_v60 = vcombine.low %v565_v46, %v579_v56  ;;  %v632_v10 = vshll.u32 %v523_v50, 16  ;;  %v2721_v12 = vsel %vm339_vm0, %v2252_v4, 0  ;;  %v593_v13 = vsel %vm2643_vm4, %v588_v57, %v592_v52  ;;  %v2216_v33 = vld [vmem:[%s2616_s27 + $0x8c] sm:$0x1]  ;;  %v2542_v52 = vld [vmem:[%s2616_s27 + $0x84] ss:$12 sps:$4 sm:$0xff]  }
  0x34   : > { %2455 = vmatpush3.bf16.msra.mxu1 %v2626_v8  ;;  %2440 = vmatprep.mubr.msk.bf16.mxu1 %vm326_vm3, %v2539_v39  ;;  %v602_v14 = vrot.slane %v601_v61, 4  ;;  %v615_v16 = vor.u32 %v614_v63, %v611_v58  ;;  %v874_v8 = vshrl.u32 %v2211_v0, 16  ;;  %v620_v19 = vrot.slane %v618_v55, 5  ;;  %v2217_v39 = vld [vmem:[%s2616_s27 + $0x94] sm:$0xf] }
  0x35   : > { %2447 = vmatmul.mubr.msk.bf16.vlgmr.msra.gmra.mxu0 %vm326_vm3, %v2187_v60  ;;  %2522 = vmatprep.subr.msk.bf16.mxu1 %vm339_vm0, %v2252_v4  ;;  %v628_v20 = vrot.slane %v626_v3, 5  ;;  %v877_v21 = vshll.u32 %v2211_v0, 16  ;;  %v883_v22 = vshll.u32 %v2212_v11, 16  ;;  %v888_v25 = vshrl.u32 %v2213_v17, 16  ;;  %v2220_v58 = vld [vmem:[%s2616_s27 + $0xa4] sm:$0x1] }
  0x36   : > { %2465 = vmatpush3.bf16.msra.mxu0 %v2630_v9  ;;  %v607_v7 = vsel %vm2643_vm4, %v602_v14, %v606_v62  ;;  %v616_v23 = vrot.slane %v615_v16, 4  ;;  %v876_v24 = vrot.slane %v874_v8, 4  ;;  %v634_v28 = vrot.slane %v632_v10, 5  ;;  %v2543_v63 = vld [vmem:[%s2616_s27 + $0x9c] ss:$12 sps:$4 sm:$0xff]  }
  0x37   : > { %2523 = vmatprep.subr.msk.bf16.mxu0 %vm339_vm0, %v2269_v1  ;;  %v2188_v26 = vcombine.low %v593_v13, %v607_v7  ;;  %v629_v27 = vor.u32 %v628_v20, %v625_v2  ;;  %v879_v9 = vrot.slane %v877_v21, 5  ;;  %v890_v30 = vrot.slane %v888_v25, 4  ;;  %v2221_v0 = vld [vmem:[%s2616_s27 + $0xac] sm:$0xf]  ;;  %v2223_v21 = vld [vmem:[%s2616_s27 + $0xb8] sm:$0xf] }
  0x38   : > { %v891_v31 = vshll.u32 %v2213_v17, 16  ;;  %v897_v32 = vshll.u32 %v2214_v18, 16  ;;  %v2738_v34 = vsel %vm339_vm0, %v2269_v1, 0  ;;  %v621_v36 = vsel %vm2643_vm4, %v616_v23, %v620_v19  ;;  %v2222_v1 = vld [vmem:[%s2616_s27 + $0xb0] sm:$0x1] }
  0x39   : > { %2450 = vmatprep.mubr.msk.bf16.mxu0 %vm326_vm3, %v2188_v26  ;;  %v630_v6 = vrot.slane %v629_v27, 4  ;;  %v880_v38 = vor.u32 %v879_v9, %v876_v24  ;;  %v902_v41 = vshrl.u32 %v2215_v29, 16  ;;  %v885_v42 = vrot.slane %v883_v22, 5  ;;  %v2224_v25 = vld [vmem:[%s2616_s27 + $0xbc] sm:$0x1] }
  0x3a   : > { %v893_v43 = vrot.slane %v891_v31, 5  ;;  %v905_v44 = vshll.u32 %v2215_v29, 16  ;;  %v911_v45 = vshll.u32 %v2216_v33, 16  ;;  %v916_v48 = vshrl.u32 %v2217_v39, 16  ;;  %v2544_v31 = vld [vmem:[%s2616_s27 + $0xb4] ss:$12 sps:$4 sm:$0xff]  }
  0x3b   : > { %2441 = vmatmul.mubr.msk.bf16.gmra.mxu1 %vm326_vm3, %v2540_v15  ;;  %v635_v4 = vsel %vm2643_vm4, %v630_v6, %v634_v28  ;;  %v881_v46 = vrot.slane %v880_v38, 4  ;;  %v904_v47 = vrot.slane %v902_v41, 4  ;;  %v899_v51 = vrot.slane %v897_v32, 5  ;;  %v2226_v32 = vld [vmem:[%s2616_s27 + $0xc8] sm:$0x1] }
  0x3c   : > { %2456 = vmatprep.mubr.msk.bf16.mxu1 %vm326_vm3, %v2541_v5  ;;  %v2189_v49 = vcombine.low %v621_v36, %v635_v4  ;;  %v894_v50 = vor.u32 %v893_v43, %v890_v30  ;;  %v907_v53 = vrot.slane %v905_v44, 5  ;;  %v918_v55 = vrot.slane %v916_v48, 4  ;;  %v2225_v5 = vld [vmem:[%s2616_s27 + $0xc4] sm:$0xf]  ;;  %v2788_v41 = vld [vmem:[%s3124_s1 + $0x10] sm:$0x3] }
  0x3d   : > { %v919_v56 = vshll.u32 %v2217_v39, 16  ;;  %v925_v57 = vshll.u32 %v2218_v40, 16  ;;  %v2759_v59 = vsel %vm339_vm0, %v2743_v35, 0  ;;  %v886_v60 = vsel %vm2643_vm4, %v881_v46, %v885_v42  ;;  %v2236_v40 = vld [vmem:[%s2616_s27 + $0x6c] sm:$0xf] }
  0x3e   : > { %2451 = vmatmul.mubr.msk.bf16.gmra.mxu0 %vm326_vm3, %v2189_v49  ;;  %v895_v61 = vrot.slane %v894_v50, 4  ;;  %v908_v62 = vor.u32 %v907_v53, %v904_v47  ;;  %v930_v2 = vshrl.u32 %v2219_v54, 16  ;;  %v913_v3 = vrot.slane %v911_v45, 5  ;;  %v2237_v4 = vld [vmem:[%s2616_s27 + $0x70] sm:$0x1] }
  0x3f   : > { %v921_v10 = vrot.slane %v919_v56, 5  ;;  %v933_v11 = vshll.u32 %v2219_v54, 16  ;;  %v939_v13 = vshll.u32 %v2220_v58, 16  ;;  %v944_v17 = vshrl.u32 %v2221_v0, 16  ;;  %v2238_v46 = vld [vmem:[%s2616_s27 + $0x78] sm:$0xf] }
  0x40   : > { %v900_v14 = vsel %vm2643_vm4, %v895_v61, %v899_v51  ;;  %v909_v15 = vrot.slane %v908_v62, 4  ;;  %v932_v16 = vrot.slane %v930_v2, 4  ;;  %v927_v19 = vrot.slane %v925_v57, 5  ;;  %v2239_v56 = vld [vmem:[%s2616_s27 + $0x7c] sm:$0x1] }
  0x41   : > { %v2228_v18 = vcombine.low %v886_v60, %v900_v14  ;;  %v922_v8 = vor.u32 %v921_v10, %v918_v55  ;;  %v935_v20 = vrot.slane %v933_v11, 5  ;;  %v941_v22 = vrot.slane %v939_v13, 5  ;;  %v2241_v10 = vld [vmem:[%s2616_s27 + $0x88] sm:$0x1]  ;;  %v2242_v11 = vld [vmem:[%s2616_s27 + $0x90] sm:$0xf] }
  0x42   : > { %v946_v7 = vrot.slane %v944_v17, 4  ;;  %v947_v23 = vshll.u32 %v2221_v0, 16  ;;  %v953_v24 = vshll.u32 %v2222_v1, 16  ;;  %v914_v26 = vsel %vm2643_vm4, %v909_v15, %v913_v3  ;;  %v2240_v0 = vld [vmem:[%s2616_s27 + $0x84] sm:$0xf] }
  0x43   : > { %2457 = vmatmul.mubr.msk.bf16.vlgmr.msra.gmra.mxu1 %vm326_vm3, %v2542_v52  ;;  %2466 = vmatprep.mubr.msk.bf16.mxu0 %vm326_vm3, %v2228_v18  ;;  %v923_v27 = vrot.slane %v922_v8, 4  ;;  %v936_v28 = vor.u32 %v935_v20, %v932_v16  ;;  %v958_v9 = vshrl.u32 %v2223_v21, 16  ;;  %v961_v33 = vshll.u32 %v2223_v21, 16  ;;  %v2545_v18 = vld [vmem:[%s2616_s27 + $0xc] ss:$12 sps:$4 sm:$0xff]  }
  0x44   : > { %2475 = vmatpush3.bf16.msra.mxu1 %v2721_v12  ;;  %2460 = vmatprep.mubr.msk.bf16.mxu1 %vm326_vm3, %v2543_v63  ;;  %v949_v29 = vrot.slane %v947_v23, 5  ;;  %v955_v30 = vrot.slane %v953_v24, 5  ;;  %v967_v36 = vshll.u32 %v2224_v25, 16  ;;  %v972_v39 = vshrl.u32 %v2225_v5, 16  ;;  %v2243_v23 = vld [vmem:[%s2616_s27 + $0x94] sm:$0x1] }
  0x45   : > { %2524 = vmatprep.subr.msk.bf16.mxu1 %vm339_vm0, %v2743_v35  ;;  %v928_v12 = vsel %vm2643_vm4, %v923_v27, %v927_v19  ;;  %v937_v6 = vrot.slane %v936_v28, 4  ;;  %v960_v38 = vrot.slane %v958_v9, 4  ;;  %v963_v44 = vrot.slane %v961_v33, 5  ;;  %v2246_v33 = vld [vmem:[%s2616_s27 + $0xa8] sm:$0xf] }
  0x46   : > { %v2229_v42 = vcombine.low %v914_v26, %v928_v12  ;;  %v950_v43 = vor.u32 %v949_v29, %v946_v7  ;;  %v969_v45 = vrot.slane %v967_v36, 5  ;;  %v974_v47 = vrot.slane %v972_v39, 4  ;;  %1934 = vst [vmem:[%s2927_s14 + $0x1c] sm:$0x1] %v2557_v37  ;;  %1928 = vst [vmem:[%s2927_s14 + $0x4] sm:$0x1] %v2557_v37 }
  0x47   : > { %v942_v35 = vsel %vm2643_vm4, %v937_v6, %v941_v22  ;;  %v975_v48 = vshll.u32 %v2225_v5, 16  ;;  %v981_v49 = vshll.u32 %v2226_v32, 16  ;;  %v964_v51 = vor.u32 %v963_v44, %v960_v38  ;;  %v2244_v5 = vld [vmem:[%s2616_s27 + $0x9c] sm:$0xf]  ;;  %v2245_v32 = vld [vmem:[%s2616_s27 + $0xa0] sm:$0x1] }
  0x48   : > { %2467 = vmatmul.mubr.msk.bf16.vlgmr.msra.gmra.mxu0 %vm326_vm3, %v2229_v42  ;;  %v951_v50 = vrot.slane %v950_v43, 4  ;;  %v1104_v52 = vshrl.u32 %v2236_v40, 16  ;;  %v1107_v53 = vshll.u32 %v2236_v40, 16  ;;  %v1113_v57 = vshll.u32 %v2237_v4, 16  ;;  %v2247_v38 = vld [vmem:[%s2616_s27 + $0xac] sm:$0x1] }
  0x49   : > { %2485 = vmatpush3.bf16.msra.mxu0 %v2738_v34  ;;  %v977_v54 = vrot.slane %v975_v48, 5  ;;  %v983_v55 = vrot.slane %v981_v49, 5  ;;  %v1118_v58 = vshrl.u32 %v2238_v46, 16  ;;  %v965_v61 = vrot.slane %v964_v51, 4  ;;  %v2546_v49 = vld [vmem:[%s2616_s27 + $0x24] ss:$12 sps:$4 sm:$0xff]  }
  0x4a   : > { %v956_v60 = vsel %vm2643_vm4, %v951_v50, %v955_v30  ;;  %v1106_v62 = vrot.slane %v1104_v52, 4  ;;  %v1109_v63 = vrot.slane %v1107_v53, 5  ;;  %2525 = vmatprep.subr.msk.bf16.mxu0 %vm339_vm0, %v2788_v41  ;;  %v1115_v2 = vrot.slane %v1113_v57, 5  ;;  %v2248_v57 = vld [vmem:[%s2616_s27 + $0xb4] sm:$0xf] }
  0x4b   : > { %2461 = vmatmul.mubr.msk.bf16.gmra.mxu1 %vm326_vm3, %v2544_v31  ;;  %v2230_v34 = vcombine.low %v942_v35, %v956_v60  ;;  %v978_v1 = vor.u32 %v977_v54, %v974_v47  ;;  %v1120_v3 = vrot.slane %v1118_v58, 4  ;;  %v970_v13 = vsel %vm2643_vm4, %v965_v61, %v969_v45  ;;  %v2249_v58 = vld [vmem:[%s2616_s27 + $0xb8] sm:$0x1]  ;;  %1929 = vst [vmem:[%s2927_s14 + $0x8] sm:$0xf] %v2557_v37 }
  0x4c   : > { %v1110_v14 = vor.u32 %v1109_v63, %v1106_v62  ;;  %v1121_v15 = vshll.u32 %v2238_v46, 16  ;;  %v1127_v16 = vshll.u32 %v2239_v56, 16  ;;  %v1132_v8 = vshrl.u32 %v2240_v0, 16  ;;  %v2547_v56 = vld [vmem:[%s2616_s27 + $0x3c] ss:$12 sps:$4 sm:$0xff]  }
  0x4d   : > { %2470 = vmatprep.mubr.msk.bf16.mxu0 %vm326_vm3, %v2230_v34  ;;  %v979_v17 = vrot.slane %v978_v1, 4  ;;  %v1135_v19 = vshll.u32 %v2240_v0, 16  ;;  %v1141_v20 = vshll.u32 %v2241_v10, 16  ;;  %v1146_v24 = vshrl.u32 %v2242_v11, 16  ;;  %v2250_v62 = vld [vmem:[%s2616_s27 + $0xc0] sm:$0xf] }
  0x4e   : > { %v1111_v21 = vrot.slane %v1110_v14, 4  ;;  %v1123_v22 = vrot.slane %v1121_v15, 5  ;;  %v1129_v7 = vrot.slane %v1127_v16, 5  ;;  %v1134_v26 = vrot.slane %v1132_v8, 4  ;;  %v2251_v63 = vld [vmem:[%s2616_s27 + $0xc4] sm:$0x1] }
  0x4f   : > { %v984_v25 = vsel %vm2643_vm4, %v979_v17, %v983_v55  ;;  %v1137_v27 = vrot.slane %v1135_v19, 5  ;;  %v1143_v28 = vrot.slane %v1141_v20, 5  ;;  %v1148_v31 = vrot.slane %v1146_v24, 4  ;;  %v2278_v8 = vld [vmem:[%s2616_s27 + $0x10] sm:$0xf] }
  0x50   : > { %v2231_v9 = vcombine.low %v970_v13, %v984_v25  ;;  %v1116_v29 = vsel %vm2643_vm4, %v1111_v21, %v1115_v2  ;;  %v1124_v30 = vor.u32 %v1123_v22, %v1120_v3  ;;  %v1149_v12 = vshll.u32 %v2242_v11, 16  ;;  %1930 = vst [vmem:[%s2927_s14 + $0xc] sm:$0x1] %v2557_v37  ;;  %1931 = vst [vmem:[%s2927_s14 + $0x10] sm:$0xf] %v2557_v37 }
  0x51   : > { %v1138_v36 = vor.u32 %v1137_v27, %v1134_v26  ;;  %v1155_v6 = vshll.u32 %v2243_v23, 16  ;;  %v1160_v39 = vshrl.u32 %v2244_v5, 16  ;;  %v1163_v42 = vshll.u32 %v2244_v5, 16  ;;  %v2280_v23 = vld [vmem:[%s2616_s27 + $0x1c] sm:$0xf] }
  0x52   : > { %2471 = vmatmul.mubr.msk.bf16.gmra.mxu0 %vm326_vm3, %v2231_v9  ;;  %v1125_v40 = vrot.slane %v1124_v30, 4  ;;  %v1169_v43 = vshll.u32 %v2245_v32, 16  ;;  %v1174_v44 = vshrl.u32 %v2246_v33, 16  ;;  %v1151_v4 = vrot.slane %v1149_v12, 5  ;;  %v2548_v5 = vld [vmem:[%s2616_s27 + $0x54] ss:$12 sps:$4 sm:$0xff]  }
  0x53   : > { %2486 = vmatprep.mubr.msk.bf16.mxu0 %vm326_vm3, %v2545_v18  ;;  %v1139_v45 = vrot.slane %v1138_v36, 4  ;;  %v1821_v46 = vsel %vm339_vm0, %v2788_v41, 0  ;;  %v1162_v35 = vrot.slane %v1160_v39, 4  ;;  %v1157_v48 = vrot.slane %v1155_v6, 5  ;;  %v2281_v9 = vld [vmem:[%s2616_s27 + $0x20] sm:$0x1] }
  0x54   : > { %v1130_v47 = vsel %vm2643_vm4, %v1125_v40, %v1129_v7  ;;  %v1165_v50 = vrot.slane %v1163_v42, 5  ;;  %v1171_v51 = vrot.slane %v1169_v43, 5  ;;  %v1152_v53 = vor.u32 %v1151_v4, %v1148_v31  ;;  %v2279_v7 = vld [vmem:[%s2616_s27 + $0x14] sm:$0x1]  ;;  %v2303_v6 = vld [vmem:[%s2616_s27 + $0xc] sm:$0xf] }
  0x55   : > { %v2253_v52 = vcombine.low %v1116_v29, %v1130_v47  ;;  %v1176_v54 = vrot.slane %v1174_v44, 4  ;;  %v1177_v55 = vshll.u32 %v2246_v33, 16  ;;  %v1144_v41 = vsel %vm2643_vm4, %v1139_v45, %v1143_v28  ;;  %v2304_v43 = vld [vmem:[%s2616_s27 + $0x10] sm:$0x1]  ;;  %v2305_v44 = vld [vmem:[%s2616_s27 + $0x18] sm:$0xf] }
  0x56   : > { %v1166_v60 = vor.u32 %v1165_v50, %v1162_v35  ;;  %v1183_v61 = vshll.u32 %v2247_v38, 16  ;;  %v1188_v0 = vshrl.u32 %v2248_v57, 16  ;;  %v1153_v34 = vrot.slane %v1152_v53, 4  ;;  %1932 = vst [vmem:[%s2927_s14 + $0x14] sm:$0x1] %v2557_v37 }
  0x57   : > { %2476 = vmatprep.mubr.msk.bf16.mxu1 %vm326_vm3, %v2253_v52  ;;  %v1179_v1 = vrot.slane %v1177_v55, 5  ;;  %v1191_v2 = vshll.u32 %v2248_v57, 16  ;;  %v1197_v3 = vshll.u32 %v2249_v58, 16  ;;  %v1202_v14 = vshrl.u32 %v2250_v62, 16  ;;  %v2282_v55 = vld [vmem:[%s2616_s27 + $0x28] sm:$0xf] }
  0x58   : > { %v1167_v10 = vrot.slane %v1166_v60, 4  ;;  %v1185_v11 = vrot.slane %v1183_v61, 5  ;;  %v1190_v13 = vrot.slane %v1188_v0, 4  ;;  %v1158_v15 = vsel %vm2643_vm4, %v1153_v34, %v1157_v48  ;;  %v2306_v48 = vld [vmem:[%s2616_s27 + $0x1c] sm:$0x1] }
  0x59   : > { %v1180_v16 = vor.u32 %v1179_v1, %v1176_v54  ;;  %v1193_v17 = vrot.slane %v1191_v2, 5  ;;  %v1199_v18 = vrot.slane %v1197_v3, 5  ;;  %v2254_v19 = vcombine.low %v1144_v41, %v1158_v15  ;;  %v2283_v60 = vld [vmem:[%s2616_s27 + $0x2c] sm:$0x1]  ;;  %v2284_v34 = vld [vmem:[%s2616_s27 + $0x34] sm:$0xf] }
  0x5a   : > { %2487 = vmatmul.mubr.msk.bf16.vlgmr.msra.gmra.mxu0 %vm326_vm3, %v2546_v49  ;;  %v1172_v20 = vsel %vm2643_vm4, %v1167_v10, %v1171_v51  ;;  %v1204_v21 = vrot.slane %v1202_v14, 4  ;;  %v1205_v22 = vshll.u32 %v2250_v62, 16  ;;  %v1211_v26 = vshll.u32 %v2251_v63, 16  ;;  %1935 = vst [vmem:[%s2927_s14 + $0x20] sm:$0xf] %v2557_v37 }
  0x5b   : > { %2505 = vmatpush3.bf16.msra.mxu0 %v1821_v46  ;;  %v1181_v24 = vrot.slane %v1180_v16, 4  ;;  %2490 = vmatprep.mubr.msk.bf16.mxu0 %vm326_vm3, %v2547_v56  ;;  %v1194_v25 = vor.u32 %v1193_v17, %v1190_v13  ;;  %v1453_v27 = vshrl.u32 %v2278_v8, 16  ;;  %v1456_v29 = vshll.u32 %v2278_v8, 16  ;;  %v2307_v17 = vld [vmem:[%s2616_s27 + $0x24] sm:$0xf] }
  0x5c   : > { %2477 = vmatmul.mubr.msk.bf16.vlgmr.msra.gmra.mxu1 %vm326_vm3, %v2254_v19  ;;  %v1207_v28 = vrot.slane %v1205_v22, 5  ;;  %v1462_v30 = vshll.u32 %v2279_v7, 16  ;;  %v1467_v31 = vshrl.u32 %v2280_v23, 16  ;;  %v1213_v36 = vrot.slane %v1211_v26, 5  ;;  %1936 = vst [vmem:[%s2927_s14 + $0x24] sm:$0x1] %v2557_v37 }
  0x5d   : > { %2495 = vmatpush3.bf16.msra.mxu1 %v2759_v59  ;;  %v1186_v32 = vsel %vm2643_vm4, %v1181_v24, %v1185_v11  ;;  %v1195_v33 = vrot.slane %v1194_v25, 4  ;;  %v1455_v12 = vrot.slane %v1453_v27, 4  ;;  %v1458_v40 = vrot.slane %v1456_v29, 5  ;;  %v2285_v11 = vld [vmem:[%s2616_s27 + $0x38] sm:$0x1] }
  0x5e   : > { %v2255_v38 = vcombine.low %v1172_v20, %v1186_v32  ;;  %v1208_v39 = vor.u32 %v1207_v28, %v1204_v21  ;;  %v1464_v42 = vrot.slane %v1462_v30, 5  ;;  %v1469_v4 = vrot.slane %v1467_v31, 4  ;;  %v2308_v21 = vld [vmem:[%s2616_s27 + $0x28] sm:$0x1]  ;;  %v2309_v25 = vld [vmem:[%s2616_s27 + $0x30] sm:$0xf] }
  0x5f   : > { %v1200_v45 = vsel %vm2643_vm4, %v1195_v33, %v1199_v18  ;;  %v1470_v59 = vshll.u32 %v2280_v23, 16  ;;  %v1476_v46 = vshll.u32 %v2281_v9, 16  ;;  %v1459_v47 = vor.u32 %v1458_v40, %v1455_v12  ;;  %v2310_v31 = vld [vmem:[%s2616_s27 + $0x34] sm:$0x1]  ;;  %1937 = vst [vmem:[%s2927_s14 + $0x28] sm:$0xf] %v2557_v37 }
  0x60   : > { %2480 = vmatprep.mubr.msk.bf16.mxu1 %vm326_vm3, %v2255_v38  ;;  %v1209_v35 = vrot.slane %v1208_v39, 4  ;;  %v1683_v49 = vshrl.u32 %v2303_v6, 16  ;;  %v1686_v50 = vshll.u32 %v2303_v6, 16  ;;  %v1692_v53 = vshll.u32 %v2304_v43, 16  ;;  %v2286_v38 = vld [vmem:[%s2616_s27 + $0x40] sm:$0xf] }
  0x61   : > { %v1472_v51 = vrot.slane %v1470_v59, 5  ;;  %v1478_v52 = vrot.slane %v1476_v46, 5  ;;  %v1697_v54 = vshrl.u32 %v2305_v44, 16  ;;  %v1460_v57 = vrot.slane %v1459_v47, 4  ;;  %1938 = vst [vmem:[%s2927_s14 + $0x2c] sm:$0x1] %v2557_v37 }
  0x62   : > { %v1214_v56 = vsel %vm2643_vm4, %v1209_v35, %v1213_v36  ;;  %2491 = vmatmul.mubr.msk.bf16.gmra.mxu0 %vm326_vm3, %v2548_v5  ;;  %v1685_v58 = vrot.slane %v1683_v49, 4  ;;  %v1688_v41 = vrot.slane %v1686_v50, 5  ;;  %v1694_v63 = vrot.slane %v1692_v53, 5  ;;  %v2288_v35 = vld [vmem:[%s2616_s27 + $0x4c] sm:$0xf] }
  0x63   : > { %v2256_v61 = vcombine.low %v1200_v45, %v1214_v56  ;;  %v1473_v62 = vor.u32 %v1472_v51, %v1469_v4  ;;  %v1699_v0 = vrot.slane %v1697_v54, 4  ;;  %v1465_v1 = vsel %vm2643_vm4, %v1460_v57, %v1464_v42  ;;  %v2289_v57 = vld [vmem:[%s2616_s27 + $0x50] sm:$0x1]  ;;  %1939 = vst [vmem:[%s2927_s14 + $0x30] sm:$0xf] %v2557_v37 }
  0x64   : > { %v1689_v2 = vor.u32 %v1688_v41, %v1685_v58  ;;  %v1700_v3 = vshll.u32 %v2305_v44, 16  ;;  %v1706_v10 = vshll.u32 %v2306_v48, 16  ;;  %v1481_v14 = vshrl.u32 %v2282_v55, 16  ;;  %v2287_v44 = vld [vmem:[%s2616_s27 + $0x44] sm:$0x1] }
  0x65   : > { %2481 = vmatmul.mubr.msk.bf16.gmra.mxu1 %vm326_vm3, %v2256_v61  ;;  %v1474_v13 = vrot.slane %v1473_v62, 4  ;;  %v1484_v15 = vshll.u32 %v2282_v55, 16  ;;  %v1490_v16 = vshll.u32 %v2283_v60, 16  ;;  %v1495_v20 = vshrl.u32 %v2284_v34, 16  ;;  %1940 = vst [vmem:[%s2927_s14 + $0x34] sm:$0x1] %v2557_v37 }
  0x66   : > { %v1690_v18 = vrot.slane %v1689_v2, 4  ;;  %v1702_v8 = vrot.slane %v1700_v3, 5  ;;  %v1708_v19 = vrot.slane %v1706_v10, 5  ;;  %v1483_v7 = vrot.slane %v1481_v14, 4  ;;  %v2313_v10 = vld [vmem:[%s2616_s27 + $0x48] sm:$0xf] }
  0x67   : > { %v1479_v22 = vsel %vm2643_vm4, %v1474_v13, %v1478_v52  ;;  %v1486_v23 = vrot.slane %v1484_v15, 5  ;;  %v1492_v24 = vrot.slane %v1490_v16, 5  ;;  %v1497_v5 = vrot.slane %v1495_v20, 4  ;;  %v2312_v16 = vld [vmem:[%s2616_s27 + $0x40] sm:$0x1] }
  0x68   : > { %v2295_v26 = vcombine.low %v1465_v1, %v1479_v22  ;;  %v1695_v27 = vsel %vm2643_vm4, %v1690_v18, %v1694_v63  ;;  %v1703_v28 = vor.u32 %v1702_v8, %v1699_v0  ;;  %v1498_v29 = vshll.u32 %v2284_v34, 16  ;;  %v2311_v0 = vld [vmem:[%s2616_s27 + $0x3c] sm:$0xf]  ;;  %v2314_v8 = vld [vmem:[%s2616_s27 + $0x4c] sm:$0x1] }
  0x69   : > { %v1487_v9 = vor.u32 %v1486_v23, %v1483_v7  ;;  %v1504_v30 = vshll.u32 %v2285_v11, 16  ;;  %v1711_v32 = vshrl.u32 %v2307_v17, 16  ;;  %v1714_v36 = vshll.u32 %v2307_v17, 16  ;;  %v2290_v23 = vld [vmem:[%s2616_s27 + $0x58] sm:$0xf] }
  0x6a   : > { %2496 = vmatprep.mubr.msk.bf16.mxu1 %vm326_vm3, %v2295_v26  ;;  %v1704_v33 = vrot.slane %v1703_v28, 4  ;;  %v1720_v12 = vshll.u32 %v2308_v21, 16  ;;  %v1725_v6 = vshrl.u32 %v2309_v25, 16  ;;  %v1500_v40 = vrot.slane %v1498_v29, 5  ;;  %v2291_v28 = vld [vmem:[%s2616_s27 + $0x5c] sm:$0x1] }
  0x6b   : > { %v1488_v39 = vrot.slane %v1487_v9, 4  ;;  %v1506_v42 = vrot.slane %v1504_v30, 5  ;;  %v1713_v43 = vrot.slane %v1711_v32, 4  ;;  %v1716_v4 = vrot.slane %v1714_v36, 5  ;;  %1941 = vst [vmem:[%s2927_s14 + $0x38] sm:$0xf] %v2557_v37 }
  0x6c   : > { %v1709_v45 = vsel %vm2643_vm4, %v1704_v33, %v1708_v19  ;;  %v1722_v59 = vrot.slane %v1720_v12, 5  ;;  %v1727_v46 = vrot.slane %v1725_v6, 4  ;;  %v1501_v49 = vor.u32 %v1500_v40, %v1497_v5  ;;  %1942 = vst [vmem:[%s2927_s14 + $0x3c] sm:$0x1] %v2557_v37  ;;  %1943 = vst [vmem:[%s2927_s14 + $0x40] sm:$0xf] %v2557_v37 }
  0x6d   : > { %v2320_v47 = vcombine.low %v1695_v27, %v1709_v45  ;;  %v1493_v48 = vsel %vm2643_vm4, %v1488_v39, %v1492_v24  ;;  %v1728_v50 = vshll.u32 %v2309_v25, 16  ;;  %v1717_v51 = vor.u32 %v1716_v4, %v1713_v43  ;;  %1944 = vst [vmem:[%s2927_s14 + $0x44] sm:$0x1] %v2557_v37  ;;  %1945 = vst [vmem:[%s2927_s14 + $0x48] sm:$0xf] %v2557_v37 }
  0x6e   : > { %v1734_v52 = vshll.u32 %v2310_v31, 16  ;;  %v1509_v53 = vshrl.u32 %v2286_v38, 16  ;;  %v1512_v54 = vshll.u32 %v2286_v38, 16  ;;  %v1502_v55 = vrot.slane %v1501_v49, 4  ;;  %v2292_v31 = vld [vmem:[%s2616_s27 + $0x64] sm:$0xf] }
  0x6f   : > { %2506 = vmatprep.mubr.msk.bf16.mxu0 %vm326_vm3, %v2320_v47  ;;  %v1730_v56 = vrot.slane %v1728_v50, 5  ;;  %v1518_v58 = vshll.u32 %v2287_v44, 16  ;;  %v1523_v41 = vshrl.u32 %v2288_v35, 16  ;;  %v1718_v60 = vrot.slane %v1717_v51, 4  ;;  %v2293_v38 = vld [vmem:[%s2616_s27 + $0x68] sm:$0x1] }
  0x70   : > { %v1736_v61 = vrot.slane %v1734_v52, 5  ;;  %v1511_v62 = vrot.slane %v1509_v53, 4  ;;  %v1514_v63 = vrot.slane %v1512_v54, 5  ;;  %v1507_v34 = vsel %vm2643_vm4, %v1502_v55, %v1506_v42  ;;  %v2317_v49 = vld [vmem:[%s2616_s27 + $0x60] sm:$0xf] }
  0x71   : > { %v1731_v1 = vor.u32 %v1730_v56, %v1727_v46  ;;  %v1520_v2 = vrot.slane %v1518_v58, 5  ;;  %v1525_v3 = vrot.slane %v1523_v41, 4  ;;  %v2296_v11 = vcombine.low %v1493_v48, %v1507_v34  ;;  %v2316_v54 = vld [vmem:[%s2616_s27 + $0x58] sm:$0x1]  ;;  %v2318_v34 = vld [vmem:[%s2616_s27 + $0x64] sm:$0x1] }
  0x72   : > { %v1723_v13 = vsel %vm2643_vm4, %v1718_v60, %v1722_v59  ;;  %v1515_v14 = vor.u32 %v1514_v63, %v1511_v62  ;;  %v1526_v15 = vshll.u32 %v2288_v35, 16  ;;  %v1532_v18 = vshll.u32 %v2289_v57, 16  ;;  %v2315_v59 = vld [vmem:[%s2616_s27 + $0x54] sm:$0xf]  ;;  %1946 = vst [vmem:[%s2927_s14 + $0x4c] sm:$0x1] %v2557_v37 }
  0x73   : > { %v1732_v17 = vrot.slane %v1731_v1, 4  ;;  %v1739_v19 = vshrl.u32 %v2311_v0, 16  ;;  %v1742_v20 = vshll.u32 %v2311_v0, 16  ;;  %2497 = vmatmul.mubr.msk.bf16.vlgmr.msra.gmra.mxu1 %vm326_vm3, %v2296_v11  ;;  %v1753_v7 = vshrl.u32 %v2313_v10, 16 }
  0x74   : > { %v1516_v21 = vrot.slane %v1515_v14, 4  ;;  %v1528_v22 = vrot.slane %v1526_v15, 5  ;;  %v1748_v27 = vshll.u32 %v2312_v16, 16  ;;  %v1534_v30 = vrot.slane %v1532_v18, 5 }
  0x75   : > { %v1737_v24 = vsel %vm2643_vm4, %v1732_v17, %v1736_v61  ;;  %v1741_v25 = vrot.slane %v1739_v19, 4  ;;  %v1744_v26 = vrot.slane %v1742_v20, 5  ;;  %v1755_v33 = vrot.slane %v1753_v7, 4 }
  0x76   : > { %v2321_v5 = vcombine.low %v1723_v13, %v1737_v24  ;;  %v1521_v9 = vsel %vm2643_vm4, %v1516_v21, %v1520_v2  ;;  %v1529_v29 = vor.u32 %v1528_v22, %v1525_v3  ;;  %v1756_v36 = vshll.u32 %v2313_v10, 16 }
  0x77   : > { %v1745_v32 = vor.u32 %v1744_v26, %v1741_v25  ;;  %v1762_v12 = vshll.u32 %v2314_v8, 16  ;;  %v1537_v39 = vshrl.u32 %v2290_v23, 16  ;;  %v1540_v40 = vshll.u32 %v2290_v23, 16 }
  0x78   : > { %2507 = vmatmul.mubr.msk.bf16.vlgmr.msra.gmra.mxu0 %vm326_vm3, %v2321_v5  ;;  %v1530_v6 = vrot.slane %v1529_v29, 4  ;;  %v1546_v42 = vshll.u32 %v2291_v28, 16  ;;  %v1750_v44 = vrot.slane %v1748_v27, 5  ;;  %v1758_v45 = vrot.slane %v1756_v36, 5 }
  0x79   : > { %v1746_v43 = vrot.slane %v1745_v32, 4  ;;  %v1551_v4 = vshrl.u32 %v2292_v31, 16  ;;  %v1764_v35 = vrot.slane %v1762_v12, 5  ;;  %v1539_v47 = vrot.slane %v1537_v39, 4 }
  0x7a   : > { %v1535_v46 = vsel %vm2643_vm4, %v1530_v6, %v1534_v30  ;;  %v1542_v48 = vrot.slane %v1540_v40, 5  ;;  %v1759_v51 = vor.u32 %v1758_v45, %v1755_v33  ;;  %v1548_v52 = vrot.slane %v1546_v42, 5 }
  0x7b   : > { %v2297_v50 = vcombine.low %v1521_v9, %v1535_v46  ;;  %v1553_v53 = vrot.slane %v1551_v4, 4  ;;  %v1554_v56 = vshll.u32 %v2292_v31, 16  ;;  %v1560_v57 = vshll.u32 %v2293_v38, 16 }
  0x7c   : > { %v1543_v55 = vor.u32 %v1542_v48, %v1539_v47  ;;  %v1767_v58 = vshrl.u32 %v2315_v59, 16  ;;  %v1751_v41 = vsel %vm2643_vm4, %v1746_v43, %v1750_v44  ;;  %v1760_v60 = vrot.slane %v1759_v51, 4 }
  0x7d   : > { %2500 = vmatprep.mubr.msk.bf16.mxu1 %vm326_vm3, %v2297_v50  ;;  %v1770_v61 = vshll.u32 %v2315_v59, 16  ;;  %v1781_v62 = vshrl.u32 %v2317_v49, 16  ;;  %v1556_v0 = vrot.slane %v1554_v56, 5  ;;  %v1776_v2 = vshll.u32 %v2316_v54, 16 }
  0x7e   : > { %v1544_v63 = vrot.slane %v1543_v55, 4  ;;  %v1769_v1 = vrot.slane %v1767_v58, 4  ;;  %v1765_v3 = vsel %vm2643_vm4, %v1760_v60, %v1764_v35  ;;  %v1562_v10 = vrot.slane %v1560_v57, 5 }
  0x7f   : > { %v1772_v11 = vrot.slane %v1770_v61, 5  ;;  %v2322_v13 = vcombine.low %v1751_v41, %v1765_v3  ;;  %v1557_v14 = vor.u32 %v1556_v0, %v1553_v53  ;;  %v1783_v15 = vrot.slane %v1781_v62, 4 }
  0x80   : > { %v1784_v16 = vshll.u32 %v2317_v49, 16  ;;  %v1790_v18 = vshll.u32 %v2318_v34, 16  ;;  %v1549_v8 = vsel %vm2643_vm4, %v1544_v63, %v1548_v52  ;;  %v1778_v20 = vrot.slane %v1776_v2, 5 }
  0x81   : > { %v1773_v17 = vor.u32 %v1772_v11, %v1769_v1  ;;  %2510 = vmatprep.mubr.msk.bf16.mxu0 %vm326_vm3, %v2322_v13  ;;  %v1558_v19 = vrot.slane %v1557_v14, 4  ;;  %vm2052_vm5 = vcmask 1043456   ;;  %vm2053_vm6 = vsmask.f32 7938 }
  0x82   : > { %v1786_v21 = vrot.slane %v1784_v16, 5  ;;  %v1792_v24 = vrot.slane %v1790_v18, 5  ;;  %vm2058_vm7 = vcmask 1040384   ;;  %vm2059_vm8 = vsmask.f32 256  ;;  %vm3035_vm9 = vmand %vm2052_vm5, %vm2053_vm6 }
  0x83   : > { %v1774_v22 = vrot.slane %v1773_v17, 4  ;;  %v1563_v7 = vsel %vm2643_vm4, %v1558_v19, %v1562_v10  ;;  %vm3042_vm10 = vmand %vm2058_vm7, %vm2059_vm8 }
  0x84   : > { %v1787_v23 = vor.u32 %v1786_v21, %v1783_v15  ;;  %v2298_v25 = vcombine.low %v1549_v8, %v1563_v7 }
  0x85   : > { %v1779_v26 = vsel %vm2643_vm4, %v1774_v22, %v1778_v20 }
  0x86   : > { %v1788_v27 = vrot.slane %v1787_v23, 4  ;;  %2501 = vmatmul.mubr.msk.bf16.gmra.mxu1 %vm326_vm3, %v2298_v25 }
  0x88   : > { %v1793_v28 = vsel %vm2643_vm4, %v1788_v27, %v1792_v24 }
  0x89   : > { %v2323_v5 = vcombine.low %v1779_v26, %v1793_v28 }
  0x8b   : > { %2511 = vmatmul.mubr.msk.bf16.gmra.mxu0 %vm326_vm3, %v2323_v5 }
  0xe6   : > { %v2428_v9 = vpop.f32.mrf.mxu0 }
  0xe8   : > { %v377_v29 = vpop.f32.mrf.mxu0 }
  0xea   : > { %v2429_v32 = vpop.f32.mrf.mxu0 }
  0xeb   : > { %v2949_v30 = vpop.f32.mrf.mxu1 }
  0xec   : > { %v380_v36 = vpop.f32.mrf.mxu0 }
  0xed   : > { %v2951_v31 = vpop.f32.mrf.mxu1 }
  0xef   : > { %v2953_v33 = vpop.f32.mrf.mxu1 }
  0xf1   : > { %v2955_v12 = vpop.f32.mrf.mxu1 }
  0xf3   : > { %v2438_v6 = vpop.f32.mrf.mxu1 }
  0xf4   : > { %v486_v16 = vadd.f32 %v2438_v6, %v2428_v9 }
  0xf5   : > { %v2448_v38 = vpop.f32.mrf.mxu0  ;;  %v477_v39 = vpop.f32.mrf.mxu1 }
  0xf6   : > { %v478_v18 = vadd.f32 %v477_v39, %v377_v29  ;;  %v732_v19 = vadd.f32 %v2448_v38, %v486_v16 }
  0xf7   : > { %v699_v40 = vpop.f32.mrf.mxu0  ;;  %v2439_v42 = vpop.f32.mrf.mxu1 }
  0xf8   : > { %v489_v20 = vadd.f32 %v2439_v42, %v2429_v32  ;;  %v730_v7 = vadd.f32 %v699_v40, %v478_v18 }
  0xf9   : > { %v2449_v43 = vpop.f32.mrf.mxu0  ;;  %v480_v44 = vpop.f32.mrf.mxu1 }
  0xfa   : > { %v481_v23 = vadd.f32 %v480_v44, %v380_v36  ;;  %v733_v25 = vadd.f32 %v2449_v43, %v489_v20 }
  0xfb   : > { %v702_v45 = vpop.f32.mrf.mxu0  ;;  %v2957_v4 = vpop.f32.mrf.mxu1 }
  0xfc   : > { %v731_v5 = vadd.f32 %v702_v45, %v481_v23 }
  0xfd   : > { %v2959_v59 = vpop.f32.mrf.mxu1 }
  0xfe   : > { %v2961_v46 = vpop.f32.mrf.mxu0 }
  0xff   : > { %v2963_v35 = vpop.f32.mrf.mxu1 }
 0x100   : > { %v2965_v47 = vpop.f32.mrf.mxu0 }
 0x101   : > { %v2967_v48 = vpop.f32.mrf.mxu1 }
 0x102   : > { %v2969_v49 = vpop.f32.mrf.mxu0 }
 0x103   : > { %v2458_v50 = vpop.f32.mrf.mxu1 }
 0x104   : > { %v2971_v51 = vpop.f32.mrf.mxu0  ;;  %v851_v24 = vadd.f32 %v2458_v50, %v732_v19 }
 0x105   : > { %v818_v52 = vpop.f32.mrf.mxu1 }
 0x106   : > { %v849_v26 = vadd.f32 %v818_v52, %v730_v7 }
 0x107   : > { %v2459_v53 = vpop.f32.mrf.mxu1 }
 0x108   : > { %v2468_v54 = vpop.f32.mrf.mxu0  ;;  %v852_v9 = vadd.f32 %v2459_v53, %v733_v25  ;;  %v502_v53 = vadd.f32 %v2957_v4, %v2949_v30  ;;  %v497_v4 = vadd.f32 %v2967_v48, %v2955_v12 }
 0x109   : > { %v821_v55 = vpop.f32.mrf.mxu1  ;;  %v1081_v37 = vadd.f32 %v2468_v54, %v851_v24 }
 0x10a   : > { %v1048_v56 = vpop.f32.mrf.mxu0  ;;  %v850_v6 = vadd.f32 %v821_v55, %v731_v5  ;;  %v736_v30 = vadd.f32 %v2961_v46, %v502_v53  ;;  %v735_v25 = vadd.f32 %v2971_v51, %v497_v4 }
 0x10b   : > { %v2973_v58 = vpop.f32.mrf.mxu1  ;;  %v1079_v29 = vadd.f32 %v1048_v56, %v849_v26 }
 0x10c   : > { %v2469_v57 = vpop.f32.mrf.mxu0  ;;  %v855_v7 = vadd.f32 %v2973_v58, %v736_v30 }
 0x10d   : > { %v2975_v60 = vpop.f32.mrf.mxu1  ;;  %v1082_v42 = vadd.f32 %v2469_v57, %v852_v9  ;;  %v505_v57 = vadd.f32 %v2963_v35, %v2953_v33 }
 0x10e   : > { %v1051_v41 = vpop.f32.mrf.mxu0 }
 0x10f   : > { %v2981_v63 = vpop.f32.mrf.mxu1  ;;  %v1080_v36 = vadd.f32 %v1051_v41, %v850_v6  ;;  %v737_v20 = vadd.f32 %v2969_v49, %v505_v57  ;;  %v2339_v57 = vld [vmem:[%s2927_s14 + $0xc] sm:$0x1] }
 0x111   : > { %v2985_v34 = vpop.f32.mrf.mxu1  ;;  %v856_v48 = vadd.f32 %v2981_v63, %v737_v20 }
 0x112   : > { %v2977_v61 = vpop.f32.mrf.mxu0  ;;  %v854_v9 = vadd.f32 %v2985_v34, %v735_v25  ;;  %v2341_v25 = vld [vmem:[%s2927_s14 + $0x10] sm:$0xf] }
 0x113   : > { %v1085_v58 = vadd.f32 %v2977_v61, %v855_v7 }
 0x114   : > { %v2979_v62 = vpop.f32.mrf.mxu0 }
 0x116   : > { %v2983_v0 = vpop.f32.mrf.mxu0 }
 0x117   : > { %v1086_v6 = vadd.f32 %v2983_v0, %v856_v48 }
 0x118   : > { %v2987_v1 = vpop.f32.mrf.mxu0 }
 0x11a   : > { %v2488_v2 = vpop.f32.mrf.mxu0 }
 0x11c   : > { %v2478_v3 = vpop.f32.mrf.mxu1  ;;  %v1397_v10 = vpop.f32.mrf.mxu0 }
 0x11d   : > { %v1311_v38 = vadd.f32 %v2478_v3, %v1081_v37  ;;  %v494_v3 = vadd.f32 %v2959_v59, %v2951_v31 }
 0x11e   : > { %v1278_v11 = vpop.f32.mrf.mxu1  ;;  %v2489_v14 = vpop.f32.mrf.mxu0 }
 0x11f   : > { %v1309_v40 = vadd.f32 %v1278_v11, %v1079_v29  ;;  %v1430_v44 = vadd.f32 %v2488_v2, %v1311_v38  ;;  %v3014_v2 = vld [vmem:[%s3125_s2] ss:$0 sm:$0xff]  ;;  %v734_v19 = vadd.f32 %v2965_v47, %v494_v3  ;;  %v2337_v3 = vld [vmem:[%s2927_s14 + $0x8] sm:$0xf] }
 0x120   : > { %v2479_v13 = vpop.f32.mrf.mxu1  ;;  %v1400_v17 = vpop.f32.mrf.mxu0 }
 0x121   : > { %v1312_v43 = vadd.f32 %v2479_v13, %v1082_v42  ;;  %v1428_v16 = vadd.f32 %v1397_v10, %v1309_v40  ;;  %v853_v12 = vadd.f32 %v2975_v60, %v734_v19 }
 0x122   : > { %v1281_v15 = vpop.f32.mrf.mxu1  ;;  %v2991_v21 = vpop.f32.mrf.mxu0 }
 0x123   : > { %v1310_v18 = vadd.f32 %v1281_v15, %v1080_v36  ;;  %v1431_v55 = vadd.f32 %v2489_v14, %v1312_v43  ;;  %v1083_v63 = vadd.f32 %v2979_v62, %v853_v12  ;;  %v1084_v43 = vadd.f32 %v2987_v1, %v854_v9  ;;  %v2343_v12 = vld [vmem:[%s2927_s14 + $0x14] sm:$0x1] }
 0x124   : > { %v2995_v27 = vpop.f32.mrf.mxu0 }
 0x125   : > { %v2989_v8 = vpop.f32.mrf.mxu1  ;;  %v1429_v11 = vadd.f32 %v1400_v17, %v1310_v18 }
 0x126   : > { %v2999_v32 = vpop.f32.mrf.mxu0  ;;  %v1315_v38 = vadd.f32 %v2989_v8, %v1085_v58  ;;  %v2345_v8 = vld [vmem:[%s2927_s14 + $0x18] sm:$0xf] }
 0x127   : > { %v2993_v22 = vpop.f32.mrf.mxu1 }
 0x128   : > { %v3003_v50 = vpop.f32.mrf.mxu0  ;;  %v1313_v62 = vadd.f32 %v2993_v22, %v1083_v63 }
 0x129   : > { %v2997_v28 = vpop.f32.mrf.mxu1 }
 0x12a   : > { %v1316_v1 = vadd.f32 %v2997_v28, %v1086_v6  ;;  %v1432_v28 = vadd.f32 %v2995_v27, %v1313_v62 }
 0x12b   : > { %v3001_v39 = vpop.f32.mrf.mxu1 }
 0x12c   : > { %v1314_v22 = vadd.f32 %v3001_v39, %v1084_v43 }
 0x133   : > { %v2498_v52 = vpop.f32.mrf.mxu1 }
 0x134   : > { %v1660_v45 = vadd.f32 %v2498_v52, %v1430_v44  ;;  %v2347_v52 = vld [vmem:[%s2927_s14 + $0x1c] sm:$0x1] }
 0x135   : > { %v1627_v54 = vpop.f32.mrf.mxu1 }
 0x136   : > { %v1658_v56 = vadd.f32 %v1627_v54, %v1428_v16 }
 0x137   : > { %v2499_v10 = vpop.f32.mrf.mxu1 }
 0x138   : > { %v2508_v41 = vpop.f32.mrf.mxu0  ;;  %v1661_v15 = vadd.f32 %v2499_v10, %v1431_v55 }
 0x139   : > { %v1890_v13 = vadd.f32 %v2508_v41, %v1660_v45  ;;  %v1630_v31 = vpop.f32.mrf.mxu1 }
 0x13a   : > { %v1857_v14 = vpop.f32.mrf.mxu0  ;;  %v1659_v35 = vadd.f32 %v1630_v31, %v1429_v11 }
 0x13b   : > { %v1905_v59 = vadd.f32 %v3014_v2, %v1890_v13  ;;  %v1888_v33 = vadd.f32 %v1857_v14, %v1658_v56  ;;  %v1434_v56 = vadd.f32 %v2991_v21, %v1315_v38 }
 0x13c   : > { %v2509_v17 = vpop.f32.mrf.mxu0 }
 0x13d   : > { %v1913_v23 = vmax.f32 %v1905_v59, 0.0  ;;  %v1903_v24 = vadd.f32 %v3014_v2, %v1888_v33  ;;  %v1891_v46 = vadd.f32 %v2509_v17, %v1661_v15  ;;  %v2349_v59 = vld [vmem:[%s2927_s14 + $0x20] sm:$0xf]  ;;  %v2351_v33 = vld [vmem:[%s2927_s14 + $0x24] sm:$0x1] }
 0x13e   : > { %v1860_v26 = vpop.f32.mrf.mxu0 }
 0x13f   : > { %v2373_v5 = vpack.c.bf16 %v1913_v23, %v1913_v23  ;;  %v1911_v37 = vmax.f32 %v1903_v24, 0.0  ;;  %v1906_v47 = vadd.f32 %v3014_v2, %v1891_v46  ;;  %v1889_v49 = vadd.f32 %v1860_v26, %v1659_v35 }
 0x140   : > { %v1435_v24 = vadd.f32 %v2999_v32, %v1316_v1  ;;  %v1433_v46 = vadd.f32 %v3003_v50, %v1314_v22  ;;  %v2361_v22 = vld [vmem:[%s2927_s14 + $0x38] sm:$0xf] }
 0x141   : > { %v1988_v29 = vshrl.u32 %v2373_v5, 16  ;;  %v2371_v51 = vpack.c.bf16 %v1911_v37, %v1911_v37  ;;  %v1914_v60 = vmax.f32 %v1906_v47, 0.0  ;;  %v1904_v42 = vadd.f32 %v3014_v2, %v1889_v49 }
 0x142   : > { %v1991_v61 = vshll.u32 %v2373_v5, 16 }
 0x143   : > { %v1990_v40 = vrot.slane %v1988_v29, 7  ;;  %v1972_v36 = vshrl.u32 %v2371_v51, 16  ;;  %v2374_v44 = vpack.c.bf16 %v1914_v60, %v1914_v60  ;;  %v1975_v16 = vshll.u32 %v2371_v51, 16 }
 0x144   : > { %v1912_v18 = vmax.f32 %v1904_v42, 0.0 }
 0x145   : > { %v1993_v45 = vor.u32 %v1991_v61, %v1990_v40  ;;  %v1994_v53 = vrot.slane %v1990_v40, 4  ;;  %v1974_v54 = vrot.slane %v1972_v36, 7  ;;  %v1996_v55 = vshrl.u32 %v2374_v44, 16 }
 0x146   : > { %v2372_v41 = vpack.c.bf16 %v1912_v18, %v1912_v18  ;;  %v2502_v21 = vpop.f32.mrf.mxu1  ;;  %v1999_v30 = vshll.u32 %v2374_v44, 16 }
 0x147   : > { %v2071_v10 = vsel %vm3035_vm9, %v1993_v45, %v2345_v8  ;;  %v2074_v11 = vsel %vm3042_vm10, %v1994_v53, %v2347_v52  ;;  %v1977_v13 = vor.u32 %v1975_v16, %v1974_v54  ;;  %v1978_v15 = vrot.slane %v1974_v54, 4 }
 0x148   : > { %2346 = vst [vmem:[%s2927_s14 + $0x18] sm:$0xf] %v2071_v10  ;;  %2348 = vst [vmem:[%s2927_s14 + $0x1c] sm:$0x1] %v2074_v11  ;;  %v1998_v39 = vrot.slane %v1996_v55, 7  ;;  %v1980_v4 = vshrl.u32 %v2372_v41, 16  ;;  %v1664_v19 = vadd.f32 %v2502_v21, %v1434_v56  ;;  %v1643_v20 = vpop.f32.mrf.mxu1 }
 0x149   : > { %v2056_v14 = vsel %vm3035_vm9, %v1977_v13, %v2337_v3  ;;  %v2062_v31 = vsel %vm3042_vm10, %v1978_v15, %v2339_v57  ;;  %v1983_v35 = vshll.u32 %v2372_v41, 16  ;;  %v1662_v23 = vadd.f32 %v1643_v20, %v1432_v28  ;;  %v2363_v3 = vld [vmem:[%s2927_s14 + $0x3c] sm:$0x1]  ;;  %v2355_v21 = vld [vmem:[%s2927_s14 + $0x2c] sm:$0x1] }
 0x14a   : > { %2338 = vst [vmem:[%s2927_s14 + $0x8] sm:$0xf] %v2056_v14  ;;  %2340 = vst [vmem:[%s2927_s14 + $0xc] sm:$0x1] %v2062_v31  ;;  %v2001_v27 = vor.u32 %v1999_v30, %v1998_v39  ;;  %v2002_v7 = vrot.slane %v1998_v39, 4  ;;  %v1982_v17 = vrot.slane %v1980_v4, 7  ;;  %v2503_v26 = vpop.f32.mrf.mxu1 }
 0x14b   : > { %v2512_v48 = vpop.f32.mrf.mxu0  ;;  %v1665_v9 = vadd.f32 %v2503_v26, %v1435_v24 }
 0x14c   : > { %v2077_v5 = vsel %vm3035_vm9, %v2001_v27, %v2349_v59  ;;  %v2080_v37 = vsel %vm3042_vm10, %v2002_v7, %v2351_v33  ;;  %v1985_v47 = vor.u32 %v1983_v35, %v1982_v17  ;;  %v1986_v49 = vrot.slane %v1982_v17, 4  ;;  %v1646_v50 = vpop.f32.mrf.mxu1  ;;  %v2365_v33 = vld [vmem:[%s2927_s14 + $0x40] sm:$0xf]  ;;  %v2367_v35 = vld [vmem:[%s2927_s14 + $0x44] sm:$0x1] }
 0x14d   : > { %2350 = vst [vmem:[%s2927_s14 + $0x20] sm:$0xf] %v2077_v5  ;;  %2352 = vst [vmem:[%s2927_s14 + $0x24] sm:$0x1] %v2080_v37  ;;  %v1894_v58 = vadd.f32 %v2512_v48, %v1664_v19  ;;  %v1873_v32 = vpop.f32.mrf.mxu0  ;;  %v1663_v63 = vadd.f32 %v1646_v50, %v1433_v46 }
 0x14e   : > { %v2065_v29 = vsel %vm3035_vm9, %v1985_v47, %v2341_v25  ;;  %v2068_v51 = vsel %vm3042_vm10, %v1986_v49, %v2343_v12  ;;  %v1892_v60 = vadd.f32 %v1873_v32, %v1662_v23  ;;  %v2357_v25 = vld [vmem:[%s2927_s14 + $0x30] sm:$0xf]  ;;  %v2359_v12 = vld [vmem:[%s2927_s14 + $0x34] sm:$0x1] }
 0x14f   : > { %2342 = vst [vmem:[%s2927_s14 + $0x10] sm:$0xf] %v2065_v29  ;;  %2344 = vst [vmem:[%s2927_s14 + $0x14] sm:$0x1] %v2068_v51  ;;  %v1909_v6 = vadd.f32 %v3014_v2, %v1894_v58  ;;  %v2513_v38 = vpop.f32.mrf.mxu0 }
 0x150   : > { %v1907_v42 = vadd.f32 %v3014_v2, %v1892_v60  ;;  %v1895_v40 = vadd.f32 %v2513_v38, %v1665_v9 }
 0x151   : > { %v1917_v61 = vmax.f32 %v1909_v6, 0.0  ;;  %v1876_v36 = vpop.f32.mrf.mxu0 }
 0x152   : > { %v1915_v44 = vmax.f32 %v1907_v42, 0.0  ;;  %v1910_v43 = vadd.f32 %v3014_v2, %v1895_v40  ;;  %v1893_v62 = vadd.f32 %v1876_v36, %v1663_v63 }
 0x153   : > { %v2377_v8 = vpack.c.bf16 %v1917_v61, %v1917_v61 }
 0x154   : > { %v2375_v52 = vpack.c.bf16 %v1915_v44, %v1915_v44  ;;  %v1918_v16 = vmax.f32 %v1910_v43, 0.0  ;;  %v1908_v18 = vadd.f32 %v3014_v2, %v1893_v62  ;;  %v2353_v2 = vld [vmem:[%s2927_s14 + $0x28] sm:$0xf] }
 0x155   : > { %v2020_v45 = vshrl.u32 %v2377_v8, 16  ;;  %v2023_v1 = vshll.u32 %v2377_v8, 16 }
 0x156   : > { %v2004_v53 = vshrl.u32 %v2375_v52, 16  ;;  %v2378_v54 = vpack.c.bf16 %v1918_v16, %v1918_v16  ;;  %v1916_v55 = vmax.f32 %v1908_v18, 0.0  ;;  %v2007_v41 = vshll.u32 %v2375_v52, 16 }
 0x157   : > { %v2022_v56 = vrot.slane %v2020_v45, 7 }
 0x158   : > { %v2006_v57 = vrot.slane %v2004_v53, 7  ;;  %v2028_v10 = vshrl.u32 %v2378_v54, 16  ;;  %v2376_v11 = vpack.c.bf16 %v1916_v55, %v1916_v55  ;;  %v2031_v28 = vshll.u32 %v2378_v54, 16 }
 0x159   : > { %v2025_v13 = vor.u32 %v2023_v1, %v2022_v56  ;;  %v2026_v15 = vrot.slane %v2022_v56, 4 }
 0x15a   : > { %v2009_v39 = vor.u32 %v2007_v41, %v2006_v57  ;;  %v2010_v30 = vrot.slane %v2006_v57, 4  ;;  %v2030_v4 = vrot.slane %v2028_v10, 7  ;;  %v2012_v14 = vshrl.u32 %v2376_v11, 16 }
 0x15b   : > { %v2095_v31 = vsel %vm3035_vm9, %v2025_v13, %v2361_v22  ;;  %v2098_v59 = vsel %vm3042_vm10, %v2026_v15, %v2363_v3  ;;  %v2015_v23 = vshll.u32 %v2376_v11, 16 }
 0x15c   : > { %2362 = vst [vmem:[%s2927_s14 + $0x38] sm:$0xf] %v2095_v31  ;;  %2364 = vst [vmem:[%s2927_s14 + $0x3c] sm:$0x1] %v2098_v59  ;;  %v2083_v19 = vsel %vm3035_vm9, %v2009_v39, %v2353_v2  ;;  %v2086_v20 = vsel %vm3042_vm10, %v2010_v30, %v2355_v21  ;;  %v2033_v27 = vor.u32 %v2031_v28, %v2030_v4  ;;  %v2034_v7 = vrot.slane %v2030_v4, 4 }
 0x15d   : > { %2354 = vst [vmem:[%s2927_s14 + $0x28] sm:$0xf] %v2083_v19  ;;  %2356 = vst [vmem:[%s2927_s14 + $0x2c] sm:$0x1] %v2086_v20  ;;  %v2014_v17 = vrot.slane %v2012_v14, 7 }
 0x15e   : > { %v2101_v24 = vsel %vm3035_vm9, %v2033_v27, %v2365_v33  ;;  %v2104_v46 = vsel %vm3042_vm10, %v2034_v7, %v2367_v35 }
 0x15f   : > { %2366 = vst [vmem:[%s2927_s14 + $0x40] sm:$0xf] %v2101_v24  ;;  %2368 = vst [vmem:[%s2927_s14 + $0x44] sm:$0x1] %v2104_v46  ;;  %v2017_v48 = vor.u32 %v2015_v23, %v2014_v17  ;;  %v2018_v26 = vrot.slane %v2014_v17, 4 }
 0x161   : > { %v2089_v5 = vsel %vm3035_vm9, %v2017_v48, %v2357_v25  ;;  %v2092_v37 = vsel %vm3042_vm10, %v2018_v26, %v2359_v12 }
 0x162   : > { %2358 = vst [vmem:[%s2927_s14 + $0x30] sm:$0xf] %v2089_v5  ;;  %2360 = vst [vmem:[%s2927_s14 + $0x34] sm:$0x1] %v2092_v37 }
 0x163 PF: > { %s13_s12 = sadd.s32 1, %s2555_s12  }
 0x164   : > { %p10_p4 = scmp.ge.s32.totalorder %s13_s12, 4  }
 0x166   :  { %12 = sbr.rel (!%p10_p4) target bundleno = 1 (0x1), region = 73 }

</bundles_post_ra>
